<compile_context>
chip_gen: v7x
topology: tpu7x:2x2x1
jax: 0.10.0
libtpu: 0.0.40
codegen_flags: <defaults>
</compile_context>

<pallas_src>
import functools

import jax
import jax.numpy as jnp
from jax import lax
from jax.experimental import pallas as pl
from jax.experimental.pallas import tpu as pltpu


def _round_up(x, m):
    return ((x + m - 1) // m) * m


def _pad2d(x, rows, cols, dtype):
    x = x.astype(dtype)
    r, c = x.shape
    if r == rows and c == cols:
        return x
    return jnp.zeros((rows, cols), dtype).at[:r, :c].set(x)


def _text_classifier_kernel(ids_ref,    # SMEM (B_pad*S,) int32   (scalar prefetch)
                            emb_ref,    # HBM  (V, E_pad) f32     (memory_space=pl.ANY)
                            w1_ref,     # VMEM (E_pad, H_pad) mxu_dtype (resident)
                            b1_ref,     # VMEM (1, H_pad) f32
                            w2_ref,     # VMEM (H_pad, C_pad) mxu_dtype (resident)
                            b2_ref,     # VMEM (1, C_pad) f32
                            out_ref,    # VMEM (TB, C_pad) f32
                            rows_buf,   # VMEM (2*S, E_pad) f32 scratch (double-buffered rows)
                            sems,       # DMA semaphores (2, S)
                            pooled_ref, # VMEM (TB, E_pad) f32 scratch (mean-pooled embeddings)
                            *, B):
    i = pl.program_id(0)
    TB = out_ref.shape[0]
    E_pad = rows_buf.shape[1]
    S = sems.shape[1]
    V = emb_ref.shape[0]
    n_valid = jnp.minimum(TB, B - i * TB)   # valid (non-padded) batch rows; >= 1
    inv_s = 1.0 / S

    def tok_id(b, s):
        # Clamp so a bad id can never drive a gather DMA outside the table.
        # (nn.Embedding would raise; we degrade gracefully instead.)
        return jnp.clip(ids_ref[(i * TB + b) * S + s], 0, V - 1)

    def row_copy(b, s, slot):
        # One embedding row (1, E_pad) -> slot's row s of the gather slab.
        return pltpu.make_async_copy(
            emb_ref.at[pl.ds(tok_id(b, s), 1), :],
            rows_buf.at[pl.ds(slot * S + s, 1), :],
            sems.at[slot, s])

    def issue_fetches(b, slot):
        # All S row DMAs back-to-back -> S copies in flight, latencies overlap.
        for s in range(S):
            row_copy(b, s, slot).start()

    # Start gathering batch element 0 of this tile immediately ...
    issue_fetches(0, 0)

    # ... and zero the pooled scratch only when this tile has padded rows
    # (the fill overlaps with the in-flight DMAs).
    @pl.when(n_valid < TB)
    def _():
        pooled_ref[...] = jnp.zeros_like(pooled_ref)

    def body(b, carry):
        slot = b % 2
        # Prefetch the next element's rows into the other slot *before* the
        # waits (so its SMEM id reads are also ahead of any .wait()).
        @pl.when(b + 1 < n_valid)
        def _():
            issue_fetches(b + 1, 1 - slot)

        # Rebuild the real start descriptors (same src/dst/sem) for the waits;
        # all SMEM id reads are traced before the first wait.
        waits = [row_copy(b, s, slot) for s in range(S)]
        for cp in waits:
            cp.wait()

        base = pl.multiple_of(slot * S, S)
        rows = rows_buf[pl.ds(base, S), :]                         # (S, E_pad) f32
        pooled_ref[pl.ds(b, 1), :] = jnp.sum(rows, axis=0, keepdims=True) * inv_s
        return carry

    lax.fori_loop(0, n_valid, body, 0)

    # fc1 + ReLU + fc2: MXU matmuls (bf16 operands, f32 accumulation),
    # f32 elementwise (v5e-friendly).  C_pad=128 keeps the output store
    # lane-dense / unmasked.
    pooled = pooled_ref[...]
    h = jnp.dot(pooled.astype(w1_ref.dtype), w1_ref[...],
                preferred_element_type=jnp.float32) + b1_ref[...]
    h = jnp.maximum(h, 0.0)
    out = jnp.dot(h.astype(w2_ref.dtype), w2_ref[...],
                  preferred_element_type=jnp.float32) + b2_ref[...]
    out_ref[...] = out.astype(out_ref.dtype)


def prepare_text_classifier_params(emb, w1, b1, w2, b2, *, mxu_dtype=jnp.bfloat16):
    """One-time (model-load) padding / casting, hoisted out of the per-call path
    so the full embedding table is not re-copied in HBM on every forward."""
    f32 = jnp.float32
    V, E = emb.shape
    H = w1.shape[1]
    C = w2.shape[1]
    E_pad = _round_up(E, 128)
    H_pad = _round_up(H, 128)
    C_pad = _round_up(C, 128)

    # TODO(synk): store the table as bf16 in HBM (upcast rows post-DMA) once
    # single-row bf16 DMAs are validated on the target generation; ~2x on the
    # gather byte stream once it is bandwidth-bound.
    emb_p = _pad2d(emb, V, E_pad, f32)
    w1_p = _pad2d(w1, E_pad, H_pad, f32).astype(mxu_dtype)
    w2_p = _pad2d(w2, H_pad, C_pad, f32).astype(mxu_dtype)
    b1_p = jnp.zeros((1, H_pad), f32).at[0, :H].set(b1.astype(f32))
    b2_p = jnp.zeros((1, C_pad), f32).at[0, :C].set(b2.astype(f32))
    return dict(emb=emb_p, w1=w1_p, b1=b1_p, w2=w2_p, b2=b2_p, dims=(E, H, C))


def text_classifier_forward(ids, params, *, batch_tile=128):
    """ids: (B, S) int32 token ids.  params: prepare_text_classifier_params()."""
    f32 = jnp.float32
    B, S = ids.shape
    emb_p, w1_p, b1_p, w2_p, b2_p = (params["emb"], params["w1"], params["b1"],
                                     params["w2"], params["b2"])
    _, _, C = params["dims"]
    E_pad = emb_p.shape[1]
    H_pad = w1_p.shape[1]
    C_pad = w2_p.shape[1]

    # Batch tile: big enough to fill the MXU M dimension, capped so tiny
    # batches are not over-padded, and kept to >= 2 grid steps when possible
    # so the "parallel" batch axis can be split across v7x's two TensorCores.
    tb = max(8, min(batch_tile, _round_up(B, 8)))
    B_pad = _round_up(B, tb)
    if B_pad // tb < 2 and tb > 8:
        tb = max(8, _round_up(tb // 2, 8))
        B_pad = _round_up(B, tb)
    num_tiles = B_pad // tb

    # 1-D ids in SMEM (a 2-D SMEM array would pad the last dim to 128 words).
    ids_flat = jnp.zeros((B_pad * S,), jnp.int32)
    ids_flat = ids_flat.at[: B * S].set(ids.astype(jnp.int32).reshape(-1))

    itemsize = jnp.dtype(w1_p.dtype).itemsize
    flops = 2 * B_pad * (E_pad * H_pad + H_pad * C_pad)
    bytes_accessed = (B_pad * S * 4                          # ids
                      + B * S * E_pad * 4                    # gathered embedding rows
                      + (E_pad * H_pad + H_pad * C_pad) * itemsize
                      + (H_pad + C_pad) * 4                  # biases
                      + B_pad * C_pad * 4)                   # output

    out_padded = pl.pallas_call(
        functools.partial(_text_classifier_kernel, B=B),
        out_shape=jax.ShapeDtypeStruct((B_pad, C_pad), f32),
        grid_spec=pltpu.PrefetchScalarGridSpec(
            num_scalar_prefetch=1,                            # ids -> SMEM
            grid=(num_tiles,),
            in_specs=[
                pl.BlockSpec(memory_space=pl.ANY),                     # emb stays in HBM
                pl.BlockSpec((E_pad, H_pad), lambda i, ids: (0, 0)),   # w1 (resident)
                pl.BlockSpec((1, H_pad), lambda i, ids: (0, 0)),       # b1
                pl.BlockSpec((H_pad, C_pad), lambda i, ids: (0, 0)),   # w2 (resident)
                pl.BlockSpec((1, C_pad), lambda i, ids: (0, 0)),       # b2
            ],
            out_specs=pl.BlockSpec((tb, C_pad), lambda i, ids: (i, 0)),
            scratch_shapes=[
                pltpu.VMEM((2 * S, E_pad), f32),              # double-buffered row slab
                pltpu.SemaphoreType.DMA((2, S)),              # per-row DMA semaphores
                pltpu.VMEM((tb, E_pad), f32),                 # mean-pooled embeddings
            ],
        ),
        compiler_params=pltpu.CompilerParams(
            dimension_semantics=("parallel",)),               # batch tiles -> both v7x TCs
        cost_estimate=pl.CostEstimate(flops=flops, transcendentals=0,
                                      bytes_accessed=bytes_accessed),
    )(ids_flat, emb_p, w1_p, b1_p, w2_p, b2_p)

    return out_padded[:B, :C]


def reference_forward(ids, emb, w1, b1, w2, b2):
    x = emb[ids]                      # (B, S, E)
    x = jnp.mean(x, axis=1)           # (B, E)
    x = jnp.maximum(x @ w1 + b1, 0.0)
    return x @ w2 + b2


if __name__ == "__main__":
    # Small, deterministic shapes consistent with the module's forward.
    B, S = 2, 8          # batch, sequence length
    V, E = 64, 32        # vocab size, embedding_dim
    H, C = 32, 4         # hidden_dim, num_classes

    key = jax.random.PRNGKey(0)
    k_ids, k_emb, k_w1, k_b1, k_w2, k_b2 = jax.random.split(key, 6)

    ids = jax.random.randint(k_ids, (B, S), 0, V, dtype=jnp.int32)
    emb = jax.random.normal(k_emb, (V, E), dtype=jnp.float32)      # "glove" table
    # torch Linear stores (out, in); we store (in, out) = W.T for x @ W.
    w1 = jax.random.normal(k_w1, (E, H), dtype=jnp.float32) * 0.1
    b1 = jax.random.normal(k_b1, (H,), dtype=jnp.float32) * 0.1
    w2 = jax.random.normal(k_w2, (H, C), dtype=jnp.float32) * 0.1
    b2 = jax.random.normal(k_b2, (C,), dtype=jnp.float32) * 0.1

    params = prepare_text_classifier_params(emb, w1, b1, w2, b2)
    out = text_classifier_forward(ids, params)
    out = jax.block_until_ready(out)

    ref = reference_forward(ids, emb, w1, b1, w2, b2)
    assert out.shape == (B, C)
    # Tolerance covers bf16 MXU operands (f32 accumulation) vs. the f32 reference.
    assert jnp.allclose(out, ref, atol=5e-2, rtol=5e-2), "mismatch vs reference"

    print("KERNEL_OK")
</pallas_src>

<mosaic_0001>
module attributes {stable_mosaic.version = 11 : i64} {
  func.func @_text_classifier_kernel(%arg0: i32, %arg1: memref<64xi32, #tpu.memory_space<smem>>, %arg2: memref<64x128xf32, #tpu.memory_space<any>>, %arg3: memref<128x128xbf16, #tpu.memory_space<vmem>>, %arg4: memref<1x128xf32, #tpu.memory_space<vmem>>, %arg5: memref<128x128xbf16, #tpu.memory_space<vmem>>, %arg6: memref<1x128xf32, #tpu.memory_space<vmem>>, %arg7: memref<8x128xf32, #tpu.memory_space<vmem>>, %arg8: memref<16x128xf32, #tpu.memory_space<vmem>>, %arg9: memref<2x8x!tpu.dma_semaphore, #tpu.memory_space<semaphore_mem>>, %arg10: memref<8x128xf32, #tpu.memory_space<vmem>>) attributes {dimension_semantics = [#tpu.dimension_semantics<parallel>], iteration_bounds = array<i64: 1>, scalar_prefetch = 1 : i64, scratch_operands = 3 : i64, tpu.core_type = #tpu.core_type<tc>, window_params = [{}, {pipeline_mode = #tpu.pipeline_mode<synchronous>, transform_indices = @transform_1, window_bounds = array<i64: 128, 128>}, {pipeline_mode = #tpu.pipeline_mode<synchronous>, transform_indices = @transform_2, window_bounds = array<i64: 1, 128>}, {pipeline_mode = #tpu.pipeline_mode<synchronous>, transform_indices = @transform_3, window_bounds = array<i64: 128, 128>}, {pipeline_mode = #tpu.pipeline_mode<synchronous>, transform_indices = @transform_4, window_bounds = array<i64: 1, 128>}, {transform_indices = @transform_5, window_bounds = array<i64: 8, 128>}]} {
    %c8_i32 = arith.constant 8 : i32
    %0 = arith.muli %arg0, %c8_i32 : i32
    %c2_i32 = arith.constant 2 : i32
    %1 = arith.subi %c2_i32, %0 : i32
    %c8_i32_0 = arith.constant 8 : i32
    %2 = arith.minsi %c8_i32_0, %1 : i32
    %c8_i32_1 = arith.constant 8 : i32
    %3 = arith.muli %arg0, %c8_i32_1 : i32
    %c0_i32 = arith.constant 0 : i32
    %4 = arith.addi %3, %c0_i32 : i32
    %c8_i32_2 = arith.constant 8 : i32
    %5 = arith.muli %4, %c8_i32_2 : i32
    %c0_i32_3 = arith.constant 0 : i32
    %6 = arith.addi %5, %c0_i32_3 : i32
    %7 = arith.index_cast %6 : i32 to index
    %8 = memref.load %arg1[%7] : memref<64xi32, #tpu.memory_space<smem>>
    %c0_i32_4 = arith.constant 0 : i32
    %c63_i32 = arith.constant 63 : i32
    %9 = arith.maxsi %c0_i32_4, %8 : i32
    %10 = arith.minsi %c63_i32, %9 : i32
    %c0_i32_5 = arith.constant 0 : i32
    %c0_i32_6 = arith.constant 0 : i32
    %c0_i32_7 = arith.constant 0 : i32
    %11 = tpu.memref_slice %arg2[%10, %c0_i32_7] : memref<64x128xf32, #tpu.memory_space<any>> -> memref<1x128xf32, #tpu.memory_space<any>>
    %c0_i32_8 = arith.constant 0 : i32
    %c0_i32_9 = arith.constant 0 : i32
    %12 = tpu.memref_slice %arg8[%c0_i32_8, %c0_i32_9] : memref<16x128xf32, #tpu.memory_space<vmem>> -> memref<1x128xf32, #tpu.memory_space<vmem>>
    %13 = tpu.memref_slice %arg9[%c0_i32_5, %c0_i32_6] : memref<2x8x!tpu.dma_semaphore, #tpu.memory_space<semaphore_mem>> -> memref<1x1x!tpu.dma_semaphore, #tpu.memory_space<semaphore_mem>>
    %14 = tpu.memref_squeeze %13 : memref<1x1x!tpu.dma_semaphore, #tpu.memory_space<semaphore_mem>> -> memref<!tpu.dma_semaphore, #tpu.memory_space<semaphore_mem>>
    tpu.enqueue_dma source(%11 : memref<1x128xf32, #tpu.memory_space<any>>) target(%12 : memref<1x128xf32, #tpu.memory_space<vmem>>) target_semaphore(%14 : memref<!tpu.dma_semaphore, #tpu.memory_space<semaphore_mem>>)
    %c8_i32_10 = arith.constant 8 : i32
    %15 = arith.muli %arg0, %c8_i32_10 : i32
    %c0_i32_11 = arith.constant 0 : i32
    %16 = arith.addi %15, %c0_i32_11 : i32
    %c8_i32_12 = arith.constant 8 : i32
    %17 = arith.muli %16, %c8_i32_12 : i32
    %c1_i32 = arith.constant 1 : i32
    %18 = arith.addi %17, %c1_i32 : i32
    %19 = arith.index_cast %18 : i32 to index
    %20 = memref.load %arg1[%19] : memref<64xi32, #tpu.memory_space<smem>>
    %c0_i32_13 = arith.constant 0 : i32
    %c63_i32_14 = arith.constant 63 : i32
    %21 = arith.maxsi %c0_i32_13, %20 : i32
    %22 = arith.minsi %c63_i32_14, %21 : i32
    %c0_i32_15 = arith.constant 0 : i32
    %c1_i32_16 = arith.constant 1 : i32
    %c0_i32_17 = arith.constant 0 : i32
    %23 = tpu.memref_slice %arg2[%22, %c0_i32_17] : memref<64x128xf32, #tpu.memory_space<any>> -> memref<1x128xf32, #tpu.memory_space<any>>
    %c1_i32_18 = arith.constant 1 : i32
    %c0_i32_19 = arith.constant 0 : i32
    %24 = tpu.memref_slice %arg8[%c1_i32_18, %c0_i32_19] : memref<16x128xf32, #tpu.memory_space<vmem>> -> memref<1x128xf32, #tpu.memory_space<vmem>>
    %25 = tpu.memref_slice %arg9[%c0_i32_15, %c1_i32_16] : memref<2x8x!tpu.dma_semaphore, #tpu.memory_space<semaphore_mem>> -> memref<1x1x!tpu.dma_semaphore, #tpu.memory_space<semaphore_mem>>
    %26 = tpu.memref_squeeze %25 : memref<1x1x!tpu.dma_semaphore, #tpu.memory_space<semaphore_mem>> -> memref<!tpu.dma_semaphore, #tpu.memory_space<semaphore_mem>>
    tpu.enqueue_dma source(%23 : memref<1x128xf32, #tpu.memory_space<any>>) target(%24 : memref<1x128xf32, #tpu.memory_space<vmem>>) target_semaphore(%26 : memref<!tpu.dma_semaphore, #tpu.memory_space<semaphore_mem>>)
    %c8_i32_20 = arith.constant 8 : i32
    %27 = arith.muli %arg0, %c8_i32_20 : i32
    %c0_i32_21 = arith.constant 0 : i32
    %28 = arith.addi %27, %c0_i32_21 : i32
    %c8_i32_22 = arith.constant 8 : i32
    %29 = arith.muli %28, %c8_i32_22 : i32
    %c2_i32_23 = arith.constant 2 : i32
    %30 = arith.addi %29, %c2_i32_23 : i32
    %31 = arith.index_cast %30 : i32 to index
    %32 = memref.load %arg1[%31] : memref<64xi32, #tpu.memory_space<smem>>
    %c0_i32_24 = arith.constant 0 : i32
    %c63_i32_25 = arith.constant 63 : i32
    %33 = arith.maxsi %c0_i32_24, %32 : i32
    %34 = arith.minsi %c63_i32_25, %33 : i32
    %c0_i32_26 = arith.constant 0 : i32
    %c2_i32_27 = arith.constant 2 : i32
    %c0_i32_28 = arith.constant 0 : i32
    %35 = tpu.memref_slice %arg2[%34, %c0_i32_28] : memref<64x128xf32, #tpu.memory_space<any>> -> memref<1x128xf32, #tpu.memory_space<any>>
    %c2_i32_29 = arith.constant 2 : i32
    %c0_i32_30 = arith.constant 0 : i32
    %36 = tpu.memref_slice %arg8[%c2_i32_29, %c0_i32_30] : memref<16x128xf32, #tpu.memory_space<vmem>> -> memref<1x128xf32, #tpu.memory_space<vmem>>
    %37 = tpu.memref_slice %arg9[%c0_i32_26, %c2_i32_27] : memref<2x8x!tpu.dma_semaphore, #tpu.memory_space<semaphore_mem>> -> memref<1x1x!tpu.dma_semaphore, #tpu.memory_space<semaphore_mem>>
    %38 = tpu.memref_squeeze %37 : memref<1x1x!tpu.dma_semaphore, #tpu.memory_space<semaphore_mem>> -> memref<!tpu.dma_semaphore, #tpu.memory_space<semaphore_mem>>
    tpu.enqueue_dma source(%35 : memref<1x128xf32, #tpu.memory_space<any>>) target(%36 : memref<1x128xf32, #tpu.memory_space<vmem>>) target_semaphore(%38 : memref<!tpu.dma_semaphore, #tpu.memory_space<semaphore_mem>>)
    %c8_i32_31 = arith.constant 8 : i32
    %39 = arith.muli %arg0, %c8_i32_31 : i32
    %c0_i32_32 = arith.constant 0 : i32
    %40 = arith.addi %39, %c0_i32_32 : i32
    %c8_i32_33 = arith.constant 8 : i32
    %41 = arith.muli %40, %c8_i32_33 : i32
    %c3_i32 = arith.constant 3 : i32
    %42 = arith.addi %41, %c3_i32 : i32
    %43 = arith.index_cast %42 : i32 to index
    %44 = memref.load %arg1[%43] : memref<64xi32, #tpu.memory_space<smem>>
    %c0_i32_34 = arith.constant 0 : i32
    %c63_i32_35 = arith.constant 63 : i32
    %45 = arith.maxsi %c0_i32_34, %44 : i32
    %46 = arith.minsi %c63_i32_35, %45 : i32
    %c0_i32_36 = arith.constant 0 : i32
    %c3_i32_37 = arith.constant 3 : i32
    %c0_i32_38 = arith.constant 0 : i32
    %47 = tpu.memref_slice %arg2[%46, %c0_i32_38] : memref<64x128xf32, #tpu.memory_space<any>> -> memref<1x128xf32, #tpu.memory_space<any>>
    %c3_i32_39 = arith.constant 3 : i32
    %c0_i32_40 = arith.constant 0 : i32
    %48 = tpu.memref_slice %arg8[%c3_i32_39, %c0_i32_40] : memref<16x128xf32, #tpu.memory_space<vmem>> -> memref<1x128xf32, #tpu.memory_space<vmem>>
    %49 = tpu.memref_slice %arg9[%c0_i32_36, %c3_i32_37] : memref<2x8x!tpu.dma_semaphore, #tpu.memory_space<semaphore_mem>> -> memref<1x1x!tpu.dma_semaphore, #tpu.memory_space<semaphore_mem>>
    %50 = tpu.memref_squeeze %49 : memref<1x1x!tpu.dma_semaphore, #tpu.memory_space<semaphore_mem>> -> memref<!tpu.dma_semaphore, #tpu.memory_space<semaphore_mem>>
    tpu.enqueue_dma source(%47 : memref<1x128xf32, #tpu.memory_space<any>>) target(%48 : memref<1x128xf32, #tpu.memory_space<vmem>>) target_semaphore(%50 : memref<!tpu.dma_semaphore, #tpu.memory_space<semaphore_mem>>)
    %c8_i32_41 = arith.constant 8 : i32
    %51 = arith.muli %arg0, %c8_i32_41 : i32
    %c0_i32_42 = arith.constant 0 : i32
    %52 = arith.addi %51, %c0_i32_42 : i32
    %c8_i32_43 = arith.constant 8 : i32
    %53 = arith.muli %52, %c8_i32_43 : i32
    %c4_i32 = arith.constant 4 : i32
    %54 = arith.addi %53, %c4_i32 : i32
    %55 = arith.index_cast %54 : i32 to index
    %56 = memref.load %arg1[%55] : memref<64xi32, #tpu.memory_space<smem>>
    %c0_i32_44 = arith.constant 0 : i32
    %c63_i32_45 = arith.constant 63 : i32
    %57 = arith.maxsi %c0_i32_44, %56 : i32
    %58 = arith.minsi %c63_i32_45, %57 : i32
    %c0_i32_46 = arith.constant 0 : i32
    %c4_i32_47 = arith.constant 4 : i32
    %c0_i32_48 = arith.constant 0 : i32
    %59 = tpu.memref_slice %arg2[%58, %c0_i32_48] : memref<64x128xf32, #tpu.memory_space<any>> -> memref<1x128xf32, #tpu.memory_space<any>>
    %c4_i32_49 = arith.constant 4 : i32
    %c0_i32_50 = arith.constant 0 : i32
    %60 = tpu.memref_slice %arg8[%c4_i32_49, %c0_i32_50] : memref<16x128xf32, #tpu.memory_space<vmem>> -> memref<1x128xf32, #tpu.memory_space<vmem>>
    %61 = tpu.memref_slice %arg9[%c0_i32_46, %c4_i32_47] : memref<2x8x!tpu.dma_semaphore, #tpu.memory_space<semaphore_mem>> -> memref<1x1x!tpu.dma_semaphore, #tpu.memory_space<semaphore_mem>>
    %62 = tpu.memref_squeeze %61 : memref<1x1x!tpu.dma_semaphore, #tpu.memory_space<semaphore_mem>> -> memref<!tpu.dma_semaphore, #tpu.memory_space<semaphore_mem>>
    tpu.enqueue_dma source(%59 : memref<1x128xf32, #tpu.memory_space<any>>) target(%60 : memref<1x128xf32, #tpu.memory_space<vmem>>) target_semaphore(%62 : memref<!tpu.dma_semaphore, #tpu.memory_space<semaphore_mem>>)
    %c8_i32_51 = arith.constant 8 : i32
    %63 = arith.muli %arg0, %c8_i32_51 : i32
    %c0_i32_52 = arith.constant 0 : i32
    %64 = arith.addi %63, %c0_i32_52 : i32
    %c8_i32_53 = arith.constant 8 : i32
    %65 = arith.muli %64, %c8_i32_53 : i32
    %c5_i32 = arith.constant 5 : i32
    %66 = arith.addi %65, %c5_i32 : i32
    %67 = arith.index_cast %66 : i32 to index
    %68 = memref.load %arg1[%67] : memref<64xi32, #tpu.memory_space<smem>>
    %c0_i32_54 = arith.constant 0 : i32
    %c63_i32_55 = arith.constant 63 : i32
    %69 = arith.maxsi %c0_i32_54, %68 : i32
    %70 = arith.minsi %c63_i32_55, %69 : i32
    %c0_i32_56 = arith.constant 0 : i32
    %c5_i32_57 = arith.constant 5 : i32
    %c0_i32_58 = arith.constant 0 : i32
    %71 = tpu.memref_slice %arg2[%70, %c0_i32_58] : memref<64x128xf32, #tpu.memory_space<any>> -> memref<1x128xf32, #tpu.memory_space<any>>
    %c5_i32_59 = arith.constant 5 : i32
    %c0_i32_60 = arith.constant 0 : i32
    %72 = tpu.memref_slice %arg8[%c5_i32_59, %c0_i32_60] : memref<16x128xf32, #tpu.memory_space<vmem>> -> memref<1x128xf32, #tpu.memory_space<vmem>>
    %73 = tpu.memref_slice %arg9[%c0_i32_56, %c5_i32_57] : memref<2x8x!tpu.dma_semaphore, #tpu.memory_space<semaphore_mem>> -> memref<1x1x!tpu.dma_semaphore, #tpu.memory_space<semaphore_mem>>
    %74 = tpu.memref_squeeze %73 : memref<1x1x!tpu.dma_semaphore, #tpu.memory_space<semaphore_mem>> -> memref<!tpu.dma_semaphore, #tpu.memory_space<semaphore_mem>>
    tpu.enqueue_dma source(%71 : memref<1x128xf32, #tpu.memory_space<any>>) target(%72 : memref<1x128xf32, #tpu.memory_space<vmem>>) target_semaphore(%74 : memref<!tpu.dma_semaphore, #tpu.memory_space<semaphore_mem>>)
    %c8_i32_61 = arith.constant 8 : i32
    %75 = arith.muli %arg0, %c8_i32_61 : i32
    %c0_i32_62 = arith.constant 0 : i32
    %76 = arith.addi %75, %c0_i32_62 : i32
    %c8_i32_63 = arith.constant 8 : i32
    %77 = arith.muli %76, %c8_i32_63 : i32
    %c6_i32 = arith.constant 6 : i32
    %78 = arith.addi %77, %c6_i32 : i32
    %79 = arith.index_cast %78 : i32 to index
    %80 = memref.load %arg1[%79] : memref<64xi32, #tpu.memory_space<smem>>
    %c0_i32_64 = arith.constant 0 : i32
    %c63_i32_65 = arith.constant 63 : i32
    %81 = arith.maxsi %c0_i32_64, %80 : i32
    %82 = arith.minsi %c63_i32_65, %81 : i32
    %c0_i32_66 = arith.constant 0 : i32
    %c6_i32_67 = arith.constant 6 : i32
    %c0_i32_68 = arith.constant 0 : i32
    %83 = tpu.memref_slice %arg2[%82, %c0_i32_68] : memref<64x128xf32, #tpu.memory_space<any>> -> memref<1x128xf32, #tpu.memory_space<any>>
    %c6_i32_69 = arith.constant 6 : i32
    %c0_i32_70 = arith.constant 0 : i32
    %84 = tpu.memref_slice %arg8[%c6_i32_69, %c0_i32_70] : memref<16x128xf32, #tpu.memory_space<vmem>> -> memref<1x128xf32, #tpu.memory_space<vmem>>
    %85 = tpu.memref_slice %arg9[%c0_i32_66, %c6_i32_67] : memref<2x8x!tpu.dma_semaphore, #tpu.memory_space<semaphore_mem>> -> memref<1x1x!tpu.dma_semaphore, #tpu.memory_space<semaphore_mem>>
    %86 = tpu.memref_squeeze %85 : memref<1x1x!tpu.dma_semaphore, #tpu.memory_space<semaphore_mem>> -> memref<!tpu.dma_semaphore, #tpu.memory_space<semaphore_mem>>
    tpu.enqueue_dma source(%83 : memref<1x128xf32, #tpu.memory_space<any>>) target(%84 : memref<1x128xf32, #tpu.memory_space<vmem>>) target_semaphore(%86 : memref<!tpu.dma_semaphore, #tpu.memory_space<semaphore_mem>>)
    %c8_i32_71 = arith.constant 8 : i32
    %87 = arith.muli %arg0, %c8_i32_71 : i32
    %c0_i32_72 = arith.constant 0 : i32
    %88 = arith.addi %87, %c0_i32_72 : i32
    %c8_i32_73 = arith.constant 8 : i32
    %89 = arith.muli %88, %c8_i32_73 : i32
    %c7_i32 = arith.constant 7 : i32
    %90 = arith.addi %89, %c7_i32 : i32
    %91 = arith.index_cast %90 : i32 to index
    %92 = memref.load %arg1[%91] : memref<64xi32, #tpu.memory_space<smem>>
    %c0_i32_74 = arith.constant 0 : i32
    %c63_i32_75 = arith.constant 63 : i32
    %93 = arith.maxsi %c0_i32_74, %92 : i32
    %94 = arith.minsi %c63_i32_75, %93 : i32
    %c0_i32_76 = arith.constant 0 : i32
    %c7_i32_77 = arith.constant 7 : i32
    %c0_i32_78 = arith.constant 0 : i32
    %95 = tpu.memref_slice %arg2[%94, %c0_i32_78] : memref<64x128xf32, #tpu.memory_space<any>> -> memref<1x128xf32, #tpu.memory_space<any>>
    %c7_i32_79 = arith.constant 7 : i32
    %c0_i32_80 = arith.constant 0 : i32
    %96 = tpu.memref_slice %arg8[%c7_i32_79, %c0_i32_80] : memref<16x128xf32, #tpu.memory_space<vmem>> -> memref<1x128xf32, #tpu.memory_space<vmem>>
    %97 = tpu.memref_slice %arg9[%c0_i32_76, %c7_i32_77] : memref<2x8x!tpu.dma_semaphore, #tpu.memory_space<semaphore_mem>> -> memref<1x1x!tpu.dma_semaphore, #tpu.memory_space<semaphore_mem>>
    %98 = tpu.memref_squeeze %97 : memref<1x1x!tpu.dma_semaphore, #tpu.memory_space<semaphore_mem>> -> memref<!tpu.dma_semaphore, #tpu.memory_space<semaphore_mem>>
    tpu.enqueue_dma source(%95 : memref<1x128xf32, #tpu.memory_space<any>>) target(%96 : memref<1x128xf32, #tpu.memory_space<vmem>>) target_semaphore(%98 : memref<!tpu.dma_semaphore, #tpu.memory_space<semaphore_mem>>)
    %c8_i32_81 = arith.constant 8 : i32
    %99 = arith.cmpi slt, %2, %c8_i32_81 : i32
    %100 = arith.extui %99 : i1 to i32
    %c0_i32_82 = arith.constant 0 : i32
    %101 = arith.cmpi ne, %100, %c0_i32_82 : i32
    scf.if %101 {
      %cst_99 = arith.constant 0.000000e+00 : f32
      %120 = vector.broadcast %cst_99 : f32 to vector<8x128xf32>
      %c0_100 = arith.constant 0 : index
      %c0_101 = arith.constant 0 : index
      %121 = vector.load %arg10[%c0_100, %c0_101] : memref<8x128xf32, #tpu.memory_space<vmem>>, vector<8x128xf32>
      tpu.vector_store %arg10[%c0_100, %c0_101], %120 {strides = array<i32>} : memref<8x128xf32, #tpu.memory_space<vmem>>, vector<8x128xf32>,
    } else {
    }
    %c0_i32_83 = arith.constant 0 : i32
    %c0_i32_84 = arith.constant 0 : i32
    %102 = arith.subi %2, %c0_i32_84 : i32
    %103 = arith.addi %c0_i32_84, %102 : i32
    %c1_i32_85 = arith.constant 1 : i32
    scf.for %arg11 = %c0_i32_84 to %103 step %c1_i32_85  : i32 {
      %c2_i32_99 = arith.constant 2 : i32
      %c0_i32_100 = arith.constant 0 : i32
      %120 = arith.cmpi eq, %c2_i32_99, %c0_i32_100 : i32
      %c1_i32_101 = arith.constant 1 : i32
      %121 = arith.select %120, %c1_i32_101, %c2_i32_99 : i32
      %122 = arith.remsi %arg11, %121 : i32
      %c0_i32_102 = arith.constant 0 : i32
      %123 = arith.cmpi ne, %122, %c0_i32_102 : i32
      %c0_i32_103 = arith.constant 0 : i32
      %124 = arith.cmpi slt, %122, %c0_i32_103 : i32
      %c0_i32_104 = arith.constant 0 : i32
      %125 = arith.cmpi slt, %121, %c0_i32_104 : i32
      %126 = arith.xori %124, %125 : i1
      %127 = arith.andi %126, %123 : i1
      %128 = arith.addi %122, %121 : i32
      %129 = arith.select %127, %128, %122 : i32
      %c1_i32_105 = arith.constant 1 : i32
      %130 = arith.addi %arg11, %c1_i32_105 : i32
      %131 = arith.cmpi slt, %130, %2 : i32
      %132 = arith.extui %131 : i1 to i32
      %c0_i32_106 = arith.constant 0 : i32
      %133 = arith.cmpi ne, %132, %c0_i32_106 : i32
      scf.if %133 {
        %c1_i32_192 = arith.constant 1 : i32
        %256 = arith.addi %arg11, %c1_i32_192 : i32
        %c1_i32_193 = arith.constant 1 : i32
        %257 = arith.subi %c1_i32_193, %129 : i32
        %c8_i32_194 = arith.constant 8 : i32
        %258 = arith.muli %arg0, %c8_i32_194 : i32
        %259 = arith.addi %258, %256 : i32
        %c8_i32_195 = arith.constant 8 : i32
        %260 = arith.muli %259, %c8_i32_195 : i32
        %c0_i32_196 = arith.constant 0 : i32
        %261 = arith.addi %260, %c0_i32_196 : i32
        %262 = arith.index_cast %261 : i32 to index
        %263 = memref.load %arg1[%262] : memref<64xi32, #tpu.memory_space<smem>>
        %c0_i32_197 = arith.constant 0 : i32
        %c63_i32_198 = arith.constant 63 : i32
        %264 = arith.maxsi %c0_i32_197, %263 : i32
        %265 = arith.minsi %c63_i32_198, %264 : i32
        %c8_i32_199 = arith.constant 8 : i32
        %266 = arith.muli %257, %c8_i32_199 : i32
        %c0_i32_200 = arith.constant 0 : i32
        %267 = arith.addi %266, %c0_i32_200 : i32
        %c0_i32_201 = arith.constant 0 : i32
        %c0_i32_202 = arith.constant 0 : i32
        %268 = tpu.memref_slice %arg2[%265, %c0_i32_202] : memref<64x128xf32, #tpu.memory_space<any>> -> memref<1x128xf32, #tpu.memory_space<any>>
        %c0_i32_203 = arith.constant 0 : i32
        %269 = tpu.memref_slice %arg8[%267, %c0_i32_203] : memref<16x128xf32, #tpu.memory_space<vmem>> -> memref<1x128xf32, #tpu.memory_space<vmem>>
        %270 = tpu.memref_slice %arg9[%257, %c0_i32_201] : memref<2x8x!tpu.dma_semaphore, #tpu.memory_space<semaphore_mem>> -> memref<1x1x!tpu.dma_semaphore, #tpu.memory_space<semaphore_mem>>
        %271 = tpu.memref_squeeze %270 : memref<1x1x!tpu.dma_semaphore, #tpu.memory_space<semaphore_mem>> -> memref<!tpu.dma_semaphore, #tpu.memory_space<semaphore_mem>>
        tpu.enqueue_dma source(%268 : memref<1x128xf32, #tpu.memory_space<any>>) target(%269 : memref<1x128xf32, #tpu.memory_space<vmem>>) target_semaphore(%271 : memref<!tpu.dma_semaphore, #tpu.memory_space<semaphore_mem>>)
        %c8_i32_204 = arith.constant 8 : i32
        %272 = arith.muli %arg0, %c8_i32_204 : i32
        %273 = arith.addi %272, %256 : i32
        %c8_i32_205 = arith.constant 8 : i32
        %274 = arith.muli %273, %c8_i32_205 : i32
        %c1_i32_206 = arith.constant 1 : i32
        %275 = arith.addi %274, %c1_i32_206 : i32
        %276 = arith.index_cast %275 : i32 to index
        %277 = memref.load %arg1[%276] : memref<64xi32, #tpu.memory_space<smem>>
        %c0_i32_207 = arith.constant 0 : i32
        %c63_i32_208 = arith.constant 63 : i32
        %278 = arith.maxsi %c0_i32_207, %277 : i32
        %279 = arith.minsi %c63_i32_208, %278 : i32
        %c8_i32_209 = arith.constant 8 : i32
        %280 = arith.muli %257, %c8_i32_209 : i32
        %c1_i32_210 = arith.constant 1 : i32
        %281 = arith.addi %280, %c1_i32_210 : i32
        %c1_i32_211 = arith.constant 1 : i32
        %c0_i32_212 = arith.constant 0 : i32
        %282 = tpu.memref_slice %arg2[%279, %c0_i32_212] : memref<64x128xf32, #tpu.memory_space<any>> -> memref<1x128xf32, #tpu.memory_space<any>>
        %c0_i32_213 = arith.constant 0 : i32
        %283 = tpu.memref_slice %arg8[%281, %c0_i32_213] : memref<16x128xf32, #tpu.memory_space<vmem>> -> memref<1x128xf32, #tpu.memory_space<vmem>>
        %284 = tpu.memref_slice %arg9[%257, %c1_i32_211] : memref<2x8x!tpu.dma_semaphore, #tpu.memory_space<semaphore_mem>> -> memref<1x1x!tpu.dma_semaphore, #tpu.memory_space<semaphore_mem>>
        %285 = tpu.memref_squeeze %284 : memref<1x1x!tpu.dma_semaphore, #tpu.memory_space<semaphore_mem>> -> memref<!tpu.dma_semaphore, #tpu.memory_space<semaphore_mem>>
        tpu.enqueue_dma source(%282 : memref<1x128xf32, #tpu.memory_space<any>>) target(%283 : memref<1x128xf32, #tpu.memory_space<vmem>>) target_semaphore(%285 : memref<!tpu.dma_semaphore, #tpu.memory_space<semaphore_mem>>)
        %c8_i32_214 = arith.constant 8 : i32
        %286 = arith.muli %arg0, %c8_i32_214 : i32
        %287 = arith.addi %286, %256 : i32
        %c8_i32_215 = arith.constant 8 : i32
        %288 = arith.muli %287, %c8_i32_215 : i32
        %c2_i32_216 = arith.constant 2 : i32
        %289 = arith.addi %288, %c2_i32_216 : i32
        %290 = arith.index_cast %289 : i32 to index
        %291 = memref.load %arg1[%290] : memref<64xi32, #tpu.memory_space<smem>>
        %c0_i32_217 = arith.constant 0 : i32
        %c63_i32_218 = arith.constant 63 : i32
        %292 = arith.maxsi %c0_i32_217, %291 : i32
        %293 = arith.minsi %c63_i32_218, %292 : i32
        %c8_i32_219 = arith.constant 8 : i32
        %294 = arith.muli %257, %c8_i32_219 : i32
        %c2_i32_220 = arith.constant 2 : i32
        %295 = arith.addi %294, %c2_i32_220 : i32
        %c2_i32_221 = arith.constant 2 : i32
        %c0_i32_222 = arith.constant 0 : i32
        %296 = tpu.memref_slice %arg2[%293, %c0_i32_222] : memref<64x128xf32, #tpu.memory_space<any>> -> memref<1x128xf32, #tpu.memory_space<any>>
        %c0_i32_223 = arith.constant 0 : i32
        %297 = tpu.memref_slice %arg8[%295, %c0_i32_223] : memref<16x128xf32, #tpu.memory_space<vmem>> -> memref<1x128xf32, #tpu.memory_space<vmem>>
        %298 = tpu.memref_slice %arg9[%257, %c2_i32_221] : memref<2x8x!tpu.dma_semaphore, #tpu.memory_space<semaphore_mem>> -> memref<1x1x!tpu.dma_semaphore, #tpu.memory_space<semaphore_mem>>
        %299 = tpu.memref_squeeze %298 : memref<1x1x!tpu.dma_semaphore, #tpu.memory_space<semaphore_mem>> -> memref<!tpu.dma_semaphore, #tpu.memory_space<semaphore_mem>>
        tpu.enqueue_dma source(%296 : memref<1x128xf32, #tpu.memory_space<any>>) target(%297 : memref<1x128xf32, #tpu.memory_space<vmem>>) target_semaphore(%299 : memref<!tpu.dma_semaphore, #tpu.memory_space<semaphore_mem>>)
        %c8_i32_224 = arith.constant 8 : i32
        %300 = arith.muli %arg0, %c8_i32_224 : i32
        %301 = arith.addi %300, %256 : i32
        %c8_i32_225 = arith.constant 8 : i32
        %302 = arith.muli %301, %c8_i32_225 : i32
        %c3_i32_226 = arith.constant 3 : i32
        %303 = arith.addi %302, %c3_i32_226 : i32
        %304 = arith.index_cast %303 : i32 to index
        %305 = memref.load %arg1[%304] : memref<64xi32, #tpu.memory_space<smem>>
        %c0_i32_227 = arith.constant 0 : i32
        %c63_i32_228 = arith.constant 63 : i32
        %306 = arith.maxsi %c0_i32_227, %305 : i32
        %307 = arith.minsi %c63_i32_228, %306 : i32
        %c8_i32_229 = arith.constant 8 : i32
        %308 = arith.muli %257, %c8_i32_229 : i32
        %c3_i32_230 = arith.constant 3 : i32
        %309 = arith.addi %308, %c3_i32_230 : i32
        %c3_i32_231 = arith.constant 3 : i32
        %c0_i32_232 = arith.constant 0 : i32
        %310 = tpu.memref_slice %arg2[%307, %c0_i32_232] : memref<64x128xf32, #tpu.memory_space<any>> -> memref<1x128xf32, #tpu.memory_space<any>>
        %c0_i32_233 = arith.constant 0 : i32
        %311 = tpu.memref_slice %arg8[%309, %c0_i32_233] : memref<16x128xf32, #tpu.memory_space<vmem>> -> memref<1x128xf32, #tpu.memory_space<vmem>>
        %312 = tpu.memref_slice %arg9[%257, %c3_i32_231] : memref<2x8x!tpu.dma_semaphore, #tpu.memory_space<semaphore_mem>> -> memref<1x1x!tpu.dma_semaphore, #tpu.memory_space<semaphore_mem>>
        %313 = tpu.memref_squeeze %312 : memref<1x1x!tpu.dma_semaphore, #tpu.memory_space<semaphore_mem>> -> memref<!tpu.dma_semaphore, #tpu.memory_space<semaphore_mem>>
        tpu.enqueue_dma source(%310 : memref<1x128xf32, #tpu.memory_space<any>>) target(%311 : memref<1x128xf32, #tpu.memory_space<vmem>>) target_semaphore(%313 : memref<!tpu.dma_semaphore, #tpu.memory_space<semaphore_mem>>)
        %c8_i32_234 = arith.constant 8 : i32
        %314 = arith.muli %arg0, %c8_i32_234 : i32
        %315 = arith.addi %314, %256 : i32
        %c8_i32_235 = arith.constant 8 : i32
        %316 = arith.muli %315, %c8_i32_235 : i32
        %c4_i32_236 = arith.constant 4 : i32
        %317 = arith.addi %316, %c4_i32_236 : i32
        %318 = arith.index_cast %317 : i32 to index
        %319 = memref.load %arg1[%318] : memref<64xi32, #tpu.memory_space<smem>>
        %c0_i32_237 = arith.constant 0 : i32
        %c63_i32_238 = arith.constant 63 : i32
        %320 = arith.maxsi %c0_i32_237, %319 : i32
        %321 = arith.minsi %c63_i32_238, %320 : i32
        %c8_i32_239 = arith.constant 8 : i32
        %322 = arith.muli %257, %c8_i32_239 : i32
        %c4_i32_240 = arith.constant 4 : i32
        %323 = arith.addi %322, %c4_i32_240 : i32
        %c4_i32_241 = arith.constant 4 : i32
        %c0_i32_242 = arith.constant 0 : i32
        %324 = tpu.memref_slice %arg2[%321, %c0_i32_242] : memref<64x128xf32, #tpu.memory_space<any>> -> memref<1x128xf32, #tpu.memory_space<any>>
        %c0_i32_243 = arith.constant 0 : i32
        %325 = tpu.memref_slice %arg8[%323, %c0_i32_243] : memref<16x128xf32, #tpu.memory_space<vmem>> -> memref<1x128xf32, #tpu.memory_space<vmem>>
        %326 = tpu.memref_slice %arg9[%257, %c4_i32_241] : memref<2x8x!tpu.dma_semaphore, #tpu.memory_space<semaphore_mem>> -> memref<1x1x!tpu.dma_semaphore, #tpu.memory_space<semaphore_mem>>
        %327 = tpu.memref_squeeze %326 : memref<1x1x!tpu.dma_semaphore, #tpu.memory_space<semaphore_mem>> -> memref<!tpu.dma_semaphore, #tpu.memory_space<semaphore_mem>>
        tpu.enqueue_dma source(%324 : memref<1x128xf32, #tpu.memory_space<any>>) target(%325 : memref<1x128xf32, #tpu.memory_space<vmem>>) target_semaphore(%327 : memref<!tpu.dma_semaphore, #tpu.memory_space<semaphore_mem>>)
        %c8_i32_244 = arith.constant 8 : i32
        %328 = arith.muli %arg0, %c8_i32_244 : i32
        %329 = arith.addi %328, %256 : i32
        %c8_i32_245 = arith.constant 8 : i32
        %330 = arith.muli %329, %c8_i32_245 : i32
        %c5_i32_246 = arith.constant 5 : i32
        %331 = arith.addi %330, %c5_i32_246 : i32
        %332 = arith.index_cast %331 : i32 to index
        %333 = memref.load %arg1[%332] : memref<64xi32, #tpu.memory_space<smem>>
        %c0_i32_247 = arith.constant 0 : i32
        %c63_i32_248 = arith.constant 63 : i32
        %334 = arith.maxsi %c0_i32_247, %333 : i32
        %335 = arith.minsi %c63_i32_248, %334 : i32
        %c8_i32_249 = arith.constant 8 : i32
        %336 = arith.muli %257, %c8_i32_249 : i32
        %c5_i32_250 = arith.constant 5 : i32
        %337 = arith.addi %336, %c5_i32_250 : i32
        %c5_i32_251 = arith.constant 5 : i32
        %c0_i32_252 = arith.constant 0 : i32
        %338 = tpu.memref_slice %arg2[%335, %c0_i32_252] : memref<64x128xf32, #tpu.memory_space<any>> -> memref<1x128xf32, #tpu.memory_space<any>>
        %c0_i32_253 = arith.constant 0 : i32
        %339 = tpu.memref_slice %arg8[%337, %c0_i32_253] : memref<16x128xf32, #tpu.memory_space<vmem>> -> memref<1x128xf32, #tpu.memory_space<vmem>>
        %340 = tpu.memref_slice %arg9[%257, %c5_i32_251] : memref<2x8x!tpu.dma_semaphore, #tpu.memory_space<semaphore_mem>> -> memref<1x1x!tpu.dma_semaphore, #tpu.memory_space<semaphore_mem>>
        %341 = tpu.memref_squeeze %340 : memref<1x1x!tpu.dma_semaphore, #tpu.memory_space<semaphore_mem>> -> memref<!tpu.dma_semaphore, #tpu.memory_space<semaphore_mem>>
        tpu.enqueue_dma source(%338 : memref<1x128xf32, #tpu.memory_space<any>>) target(%339 : memref<1x128xf32, #tpu.memory_space<vmem>>) target_semaphore(%341 : memref<!tpu.dma_semaphore, #tpu.memory_space<semaphore_mem>>)
        %c8_i32_254 = arith.constant 8 : i32
        %342 = arith.muli %arg0, %c8_i32_254 : i32
        %343 = arith.addi %342, %256 : i32
        %c8_i32_255 = arith.constant 8 : i32
        %344 = arith.muli %343, %c8_i32_255 : i32
        %c6_i32_256 = arith.constant 6 : i32
        %345 = arith.addi %344, %c6_i32_256 : i32
        %346 = arith.index_cast %345 : i32 to index
        %347 = memref.load %arg1[%346] : memref<64xi32, #tpu.memory_space<smem>>
        %c0_i32_257 = arith.constant 0 : i32
        %c63_i32_258 = arith.constant 63 : i32
        %348 = arith.maxsi %c0_i32_257, %347 : i32
        %349 = arith.minsi %c63_i32_258, %348 : i32
        %c8_i32_259 = arith.constant 8 : i32
        %350 = arith.muli %257, %c8_i32_259 : i32
        %c6_i32_260 = arith.constant 6 : i32
        %351 = arith.addi %350, %c6_i32_260 : i32
        %c6_i32_261 = arith.constant 6 : i32
        %c0_i32_262 = arith.constant 0 : i32
        %352 = tpu.memref_slice %arg2[%349, %c0_i32_262] : memref<64x128xf32, #tpu.memory_space<any>> -> memref<1x128xf32, #tpu.memory_space<any>>
        %c0_i32_263 = arith.constant 0 : i32
        %353 = tpu.memref_slice %arg8[%351, %c0_i32_263] : memref<16x128xf32, #tpu.memory_space<vmem>> -> memref<1x128xf32, #tpu.memory_space<vmem>>
        %354 = tpu.memref_slice %arg9[%257, %c6_i32_261] : memref<2x8x!tpu.dma_semaphore, #tpu.memory_space<semaphore_mem>> -> memref<1x1x!tpu.dma_semaphore, #tpu.memory_space<semaphore_mem>>
        %355 = tpu.memref_squeeze %354 : memref<1x1x!tpu.dma_semaphore, #tpu.memory_space<semaphore_mem>> -> memref<!tpu.dma_semaphore, #tpu.memory_space<semaphore_mem>>
        tpu.enqueue_dma source(%352 : memref<1x128xf32, #tpu.memory_space<any>>) target(%353 : memref<1x128xf32, #tpu.memory_space<vmem>>) target_semaphore(%355 : memref<!tpu.dma_semaphore, #tpu.memory_space<semaphore_mem>>)
        %c8_i32_264 = arith.constant 8 : i32
        %356 = arith.muli %arg0, %c8_i32_264 : i32
        %357 = arith.addi %356, %256 : i32
        %c8_i32_265 = arith.constant 8 : i32
        %358 = arith.muli %357, %c8_i32_265 : i32
        %c7_i32_266 = arith.constant 7 : i32
        %359 = arith.addi %358, %c7_i32_266 : i32
        %360 = arith.index_cast %359 : i32 to index
        %361 = memref.load %arg1[%360] : memref<64xi32, #tpu.memory_space<smem>>
        %c0_i32_267 = arith.constant 0 : i32
        %c63_i32_268 = arith.constant 63 : i32
        %362 = arith.maxsi %c0_i32_267, %361 : i32
        %363 = arith.minsi %c63_i32_268, %362 : i32
        %c8_i32_269 = arith.constant 8 : i32
        %364 = arith.muli %257, %c8_i32_269 : i32
        %c7_i32_270 = arith.constant 7 : i32
        %365 = arith.addi %364, %c7_i32_270 : i32
        %c7_i32_271 = arith.constant 7 : i32
        %c0_i32_272 = arith.constant 0 : i32
        %366 = tpu.memref_slice %arg2[%363, %c0_i32_272] : memref<64x128xf32, #tpu.memory_space<any>> -> memref<1x128xf32, #tpu.memory_space<any>>
        %c0_i32_273 = arith.constant 0 : i32
        %367 = tpu.memref_slice %arg8[%365, %c0_i32_273] : memref<16x128xf32, #tpu.memory_space<vmem>> -> memref<1x128xf32, #tpu.memory_space<vmem>>
        %368 = tpu.memref_slice %arg9[%257, %c7_i32_271] : memref<2x8x!tpu.dma_semaphore, #tpu.memory_space<semaphore_mem>> -> memref<1x1x!tpu.dma_semaphore, #tpu.memory_space<semaphore_mem>>
        %369 = tpu.memref_squeeze %368 : memref<1x1x!tpu.dma_semaphore, #tpu.memory_space<semaphore_mem>> -> memref<!tpu.dma_semaphore, #tpu.memory_space<semaphore_mem>>
        tpu.enqueue_dma source(%366 : memref<1x128xf32, #tpu.memory_space<any>>) target(%367 : memref<1x128xf32, #tpu.memory_space<vmem>>) target_semaphore(%369 : memref<!tpu.dma_semaphore, #tpu.memory_space<semaphore_mem>>)
      } else {
      }
      %c8_i32_107 = arith.constant 8 : i32
      %134 = arith.muli %arg0, %c8_i32_107 : i32
      %135 = arith.addi %134, %arg11 : i32
      %c8_i32_108 = arith.constant 8 : i32
      %136 = arith.muli %135, %c8_i32_108 : i32
      %c0_i32_109 = arith.constant 0 : i32
      %137 = arith.addi %136, %c0_i32_109 : i32
      %138 = arith.index_cast %137 : i32 to index
      %139 = memref.load %arg1[%138] : memref<64xi32, #tpu.memory_space<smem>>
      %c0_i32_110 = arith.constant 0 : i32
      %c63_i32_111 = arith.constant 63 : i32
      %140 = arith.maxsi %c0_i32_110, %139 : i32
      %141 = arith.minsi %c63_i32_111, %140 : i32
      %c8_i32_112 = arith.constant 8 : i32
      %142 = arith.muli %129, %c8_i32_112 : i32
      %c0_i32_113 = arith.constant 0 : i32
      %143 = arith.addi %142, %c0_i32_113 : i32
      %c8_i32_114 = arith.constant 8 : i32
      %144 = arith.muli %arg0, %c8_i32_114 : i32
      %145 = arith.addi %144, %arg11 : i32
      %c8_i32_115 = arith.constant 8 : i32
      %146 = arith.muli %145, %c8_i32_115 : i32
      %c1_i32_116 = arith.constant 1 : i32
      %147 = arith.addi %146, %c1_i32_116 : i32
      %148 = arith.index_cast %147 : i32 to index
      %149 = memref.load %arg1[%148] : memref<64xi32, #tpu.memory_space<smem>>
      %c0_i32_117 = arith.constant 0 : i32
      %c63_i32_118 = arith.constant 63 : i32
      %150 = arith.maxsi %c0_i32_117, %149 : i32
      %151 = arith.minsi %c63_i32_118, %150 : i32
      %c8_i32_119 = arith.constant 8 : i32
      %152 = arith.muli %129, %c8_i32_119 : i32
      %c1_i32_120 = arith.constant 1 : i32
      %153 = arith.addi %152, %c1_i32_120 : i32
      %c8_i32_121 = arith.constant 8 : i32
      %154 = arith.muli %arg0, %c8_i32_121 : i32
      %155 = arith.addi %154, %arg11 : i32
      %c8_i32_122 = arith.constant 8 : i32
      %156 = arith.muli %155, %c8_i32_122 : i32
      %c2_i32_123 = arith.constant 2 : i32
      %157 = arith.addi %156, %c2_i32_123 : i32
      %158 = arith.index_cast %157 : i32 to index
      %159 = memref.load %arg1[%158] : memref<64xi32, #tpu.memory_space<smem>>
      %c0_i32_124 = arith.constant 0 : i32
      %c63_i32_125 = arith.constant 63 : i32
      %160 = arith.maxsi %c0_i32_124, %159 : i32
      %161 = arith.minsi %c63_i32_125, %160 : i32
      %c8_i32_126 = arith.constant 8 : i32
      %162 = arith.muli %129, %c8_i32_126 : i32
      %c2_i32_127 = arith.constant 2 : i32
      %163 = arith.addi %162, %c2_i32_127 : i32
      %c8_i32_128 = arith.constant 8 : i32
      %164 = arith.muli %arg0, %c8_i32_128 : i32
      %165 = arith.addi %164, %arg11 : i32
      %c8_i32_129 = arith.constant 8 : i32
      %166 = arith.muli %165, %c8_i32_129 : i32
      %c3_i32_130 = arith.constant 3 : i32
      %167 = arith.addi %166, %c3_i32_130 : i32
      %168 = arith.index_cast %167 : i32 to index
      %169 = memref.load %arg1[%168] : memref<64xi32, #tpu.memory_space<smem>>
      %c0_i32_131 = arith.constant 0 : i32
      %c63_i32_132 = arith.constant 63 : i32
      %170 = arith.maxsi %c0_i32_131, %169 : i32
      %171 = arith.minsi %c63_i32_132, %170 : i32
      %c8_i32_133 = arith.constant 8 : i32
      %172 = arith.muli %129, %c8_i32_133 : i32
      %c3_i32_134 = arith.constant 3 : i32
      %173 = arith.addi %172, %c3_i32_134 : i32
      %c8_i32_135 = arith.constant 8 : i32
      %174 = arith.muli %arg0, %c8_i32_135 : i32
      %175 = arith.addi %174, %arg11 : i32
      %c8_i32_136 = arith.constant 8 : i32
      %176 = arith.muli %175, %c8_i32_136 : i32
      %c4_i32_137 = arith.constant 4 : i32
      %177 = arith.addi %176, %c4_i32_137 : i32
      %178 = arith.index_cast %177 : i32 to index
      %179 = memref.load %arg1[%178] : memref<64xi32, #tpu.memory_space<smem>>
      %c0_i32_138 = arith.constant 0 : i32
      %c63_i32_139 = arith.constant 63 : i32
      %180 = arith.maxsi %c0_i32_138, %179 : i32
      %181 = arith.minsi %c63_i32_139, %180 : i32
      %c8_i32_140 = arith.constant 8 : i32
      %182 = arith.muli %129, %c8_i32_140 : i32
      %c4_i32_141 = arith.constant 4 : i32
      %183 = arith.addi %182, %c4_i32_141 : i32
      %c8_i32_142 = arith.constant 8 : i32
      %184 = arith.muli %arg0, %c8_i32_142 : i32
      %185 = arith.addi %184, %arg11 : i32
      %c8_i32_143 = arith.constant 8 : i32
      %186 = arith.muli %185, %c8_i32_143 : i32
      %c5_i32_144 = arith.constant 5 : i32
      %187 = arith.addi %186, %c5_i32_144 : i32
      %188 = arith.index_cast %187 : i32 to index
      %189 = memref.load %arg1[%188] : memref<64xi32, #tpu.memory_space<smem>>
      %c0_i32_145 = arith.constant 0 : i32
      %c63_i32_146 = arith.constant 63 : i32
      %190 = arith.maxsi %c0_i32_145, %189 : i32
      %191 = arith.minsi %c63_i32_146, %190 : i32
      %c8_i32_147 = arith.constant 8 : i32
      %192 = arith.muli %129, %c8_i32_147 : i32
      %c5_i32_148 = arith.constant 5 : i32
      %193 = arith.addi %192, %c5_i32_148 : i32
      %c8_i32_149 = arith.constant 8 : i32
      %194 = arith.muli %arg0, %c8_i32_149 : i32
      %195 = arith.addi %194, %arg11 : i32
      %c8_i32_150 = arith.constant 8 : i32
      %196 = arith.muli %195, %c8_i32_150 : i32
      %c6_i32_151 = arith.constant 6 : i32
      %197 = arith.addi %196, %c6_i32_151 : i32
      %198 = arith.index_cast %197 : i32 to index
      %199 = memref.load %arg1[%198] : memref<64xi32, #tpu.memory_space<smem>>
      %c0_i32_152 = arith.constant 0 : i32
      %c63_i32_153 = arith.constant 63 : i32
      %200 = arith.maxsi %c0_i32_152, %199 : i32
      %201 = arith.minsi %c63_i32_153, %200 : i32
      %c8_i32_154 = arith.constant 8 : i32
      %202 = arith.muli %129, %c8_i32_154 : i32
      %c6_i32_155 = arith.constant 6 : i32
      %203 = arith.addi %202, %c6_i32_155 : i32
      %c8_i32_156 = arith.constant 8 : i32
      %204 = arith.muli %arg0, %c8_i32_156 : i32
      %205 = arith.addi %204, %arg11 : i32
      %c8_i32_157 = arith.constant 8 : i32
      %206 = arith.muli %205, %c8_i32_157 : i32
      %c7_i32_158 = arith.constant 7 : i32
      %207 = arith.addi %206, %c7_i32_158 : i32
      %208 = arith.index_cast %207 : i32 to index
      %209 = memref.load %arg1[%208] : memref<64xi32, #tpu.memory_space<smem>>
      %c0_i32_159 = arith.constant 0 : i32
      %c63_i32_160 = arith.constant 63 : i32
      %210 = arith.maxsi %c0_i32_159, %209 : i32
      %211 = arith.minsi %c63_i32_160, %210 : i32
      %c8_i32_161 = arith.constant 8 : i32
      %212 = arith.muli %129, %c8_i32_161 : i32
      %c7_i32_162 = arith.constant 7 : i32
      %213 = arith.addi %212, %c7_i32_162 : i32
      %c0_i32_163 = arith.constant 0 : i32
      %c0_i32_164 = arith.constant 0 : i32
      %214 = tpu.memref_slice %arg2[%141, %c0_i32_164] : memref<64x128xf32, #tpu.memory_space<any>> -> memref<1x128xf32, #tpu.memory_space<any>>
      %c0_i32_165 = arith.constant 0 : i32
      %215 = tpu.memref_slice %arg8[%143, %c0_i32_165] : memref<16x128xf32, #tpu.memory_space<vmem>> -> memref<1x128xf32, #tpu.memory_space<vmem>>
      %216 = tpu.memref_slice %arg9[%129, %c0_i32_163] : memref<2x8x!tpu.dma_semaphore, #tpu.memory_space<semaphore_mem>> -> memref<1x1x!tpu.dma_semaphore, #tpu.memory_space<semaphore_mem>>
      %217 = tpu.memref_squeeze %216 : memref<1x1x!tpu.dma_semaphore, #tpu.memory_space<semaphore_mem>> -> memref<!tpu.dma_semaphore, #tpu.memory_space<semaphore_mem>>
      tpu.wait_dma2 semaphore(%217 : memref<!tpu.dma_semaphore, #tpu.memory_space<semaphore_mem>>) src(%214 : memref<1x128xf32, #tpu.memory_space<any>>) dst(%215 : memref<1x128xf32, #tpu.memory_space<vmem>>)
      %c1_i32_166 = arith.constant 1 : i32
      %c0_i32_167 = arith.constant 0 : i32
      %218 = tpu.memref_slice %arg2[%151, %c0_i32_167] : memref<64x128xf32, #tpu.memory_space<any>> -> memref<1x128xf32, #tpu.memory_space<any>>
      %c0_i32_168 = arith.constant 0 : i32
      %219 = tpu.memref_slice %arg8[%153, %c0_i32_168] : memref<16x128xf32, #tpu.memory_space<vmem>> -> memref<1x128xf32, #tpu.memory_space<vmem>>
      %220 = tpu.memref_slice %arg9[%129, %c1_i32_166] : memref<2x8x!tpu.dma_semaphore, #tpu.memory_space<semaphore_mem>> -> memref<1x1x!tpu.dma_semaphore, #tpu.memory_space<semaphore_mem>>
      %221 = tpu.memref_squeeze %220 : memref<1x1x!tpu.dma_semaphore, #tpu.memory_space<semaphore_mem>> -> memref<!tpu.dma_semaphore, #tpu.memory_space<semaphore_mem>>
      tpu.wait_dma2 semaphore(%221 : memref<!tpu.dma_semaphore, #tpu.memory_space<semaphore_mem>>) src(%218 : memref<1x128xf32, #tpu.memory_space<any>>) dst(%219 : memref<1x128xf32, #tpu.memory_space<vmem>>)
      %c2_i32_169 = arith.constant 2 : i32
      %c0_i32_170 = arith.constant 0 : i32
      %222 = tpu.memref_slice %arg2[%161, %c0_i32_170] : memref<64x128xf32, #tpu.memory_space<any>> -> memref<1x128xf32, #tpu.memory_space<any>>
      %c0_i32_171 = arith.constant 0 : i32
      %223 = tpu.memref_slice %arg8[%163, %c0_i32_171] : memref<16x128xf32, #tpu.memory_space<vmem>> -> memref<1x128xf32, #tpu.memory_space<vmem>>
      %224 = tpu.memref_slice %arg9[%129, %c2_i32_169] : memref<2x8x!tpu.dma_semaphore, #tpu.memory_space<semaphore_mem>> -> memref<1x1x!tpu.dma_semaphore, #tpu.memory_space<semaphore_mem>>
      %225 = tpu.memref_squeeze %224 : memref<1x1x!tpu.dma_semaphore, #tpu.memory_space<semaphore_mem>> -> memref<!tpu.dma_semaphore, #tpu.memory_space<semaphore_mem>>
      tpu.wait_dma2 semaphore(%225 : memref<!tpu.dma_semaphore, #tpu.memory_space<semaphore_mem>>) src(%222 : memref<1x128xf32, #tpu.memory_space<any>>) dst(%223 : memref<1x128xf32, #tpu.memory_space<vmem>>)
      %c3_i32_172 = arith.constant 3 : i32
      %c0_i32_173 = arith.constant 0 : i32
      %226 = tpu.memref_slice %arg2[%171, %c0_i32_173] : memref<64x128xf32, #tpu.memory_space<any>> -> memref<1x128xf32, #tpu.memory_space<any>>
      %c0_i32_174 = arith.constant 0 : i32
      %227 = tpu.memref_slice %arg8[%173, %c0_i32_174] : memref<16x128xf32, #tpu.memory_space<vmem>> -> memref<1x128xf32, #tpu.memory_space<vmem>>
      %228 = tpu.memref_slice %arg9[%129, %c3_i32_172] : memref<2x8x!tpu.dma_semaphore, #tpu.memory_space<semaphore_mem>> -> memref<1x1x!tpu.dma_semaphore, #tpu.memory_space<semaphore_mem>>
      %229 = tpu.memref_squeeze %228 : memref<1x1x!tpu.dma_semaphore, #tpu.memory_space<semaphore_mem>> -> memref<!tpu.dma_semaphore, #tpu.memory_space<semaphore_mem>>
      tpu.wait_dma2 semaphore(%229 : memref<!tpu.dma_semaphore, #tpu.memory_space<semaphore_mem>>) src(%226 : memref<1x128xf32, #tpu.memory_space<any>>) dst(%227 : memref<1x128xf32, #tpu.memory_space<vmem>>)
      %c4_i32_175 = arith.constant 4 : i32
      %c0_i32_176 = arith.constant 0 : i32
      %230 = tpu.memref_slice %arg2[%181, %c0_i32_176] : memref<64x128xf32, #tpu.memory_space<any>> -> memref<1x128xf32, #tpu.memory_space<any>>
      %c0_i32_177 = arith.constant 0 : i32
      %231 = tpu.memref_slice %arg8[%183, %c0_i32_177] : memref<16x128xf32, #tpu.memory_space<vmem>> -> memref<1x128xf32, #tpu.memory_space<vmem>>
      %232 = tpu.memref_slice %arg9[%129, %c4_i32_175] : memref<2x8x!tpu.dma_semaphore, #tpu.memory_space<semaphore_mem>> -> memref<1x1x!tpu.dma_semaphore, #tpu.memory_space<semaphore_mem>>
      %233 = tpu.memref_squeeze %232 : memref<1x1x!tpu.dma_semaphore, #tpu.memory_space<semaphore_mem>> -> memref<!tpu.dma_semaphore, #tpu.memory_space<semaphore_mem>>
      tpu.wait_dma2 semaphore(%233 : memref<!tpu.dma_semaphore, #tpu.memory_space<semaphore_mem>>) src(%230 : memref<1x128xf32, #tpu.memory_space<any>>) dst(%231 : memref<1x128xf32, #tpu.memory_space<vmem>>)
      %c5_i32_178 = arith.constant 5 : i32
      %c0_i32_179 = arith.constant 0 : i32
      %234 = tpu.memref_slice %arg2[%191, %c0_i32_179] : memref<64x128xf32, #tpu.memory_space<any>> -> memref<1x128xf32, #tpu.memory_space<any>>
      %c0_i32_180 = arith.constant 0 : i32
      %235 = tpu.memref_slice %arg8[%193, %c0_i32_180] : memref<16x128xf32, #tpu.memory_space<vmem>> -> memref<1x128xf32, #tpu.memory_space<vmem>>
      %236 = tpu.memref_slice %arg9[%129, %c5_i32_178] : memref<2x8x!tpu.dma_semaphore, #tpu.memory_space<semaphore_mem>> -> memref<1x1x!tpu.dma_semaphore, #tpu.memory_space<semaphore_mem>>
      %237 = tpu.memref_squeeze %236 : memref<1x1x!tpu.dma_semaphore, #tpu.memory_space<semaphore_mem>> -> memref<!tpu.dma_semaphore, #tpu.memory_space<semaphore_mem>>
      tpu.wait_dma2 semaphore(%237 : memref<!tpu.dma_semaphore, #tpu.memory_space<semaphore_mem>>) src(%234 : memref<1x128xf32, #tpu.memory_space<any>>) dst(%235 : memref<1x128xf32, #tpu.memory_space<vmem>>)
      %c6_i32_181 = arith.constant 6 : i32
      %c0_i32_182 = arith.constant 0 : i32
      %238 = tpu.memref_slice %arg2[%201, %c0_i32_182] : memref<64x128xf32, #tpu.memory_space<any>> -> memref<1x128xf32, #tpu.memory_space<any>>
      %c0_i32_183 = arith.constant 0 : i32
      %239 = tpu.memref_slice %arg8[%203, %c0_i32_183] : memref<16x128xf32, #tpu.memory_space<vmem>> -> memref<1x128xf32, #tpu.memory_space<vmem>>
      %240 = tpu.memref_slice %arg9[%129, %c6_i32_181] : memref<2x8x!tpu.dma_semaphore, #tpu.memory_space<semaphore_mem>> -> memref<1x1x!tpu.dma_semaphore, #tpu.memory_space<semaphore_mem>>
      %241 = tpu.memref_squeeze %240 : memref<1x1x!tpu.dma_semaphore, #tpu.memory_space<semaphore_mem>> -> memref<!tpu.dma_semaphore, #tpu.memory_space<semaphore_mem>>
      tpu.wait_dma2 semaphore(%241 : memref<!tpu.dma_semaphore, #tpu.memory_space<semaphore_mem>>) src(%238 : memref<1x128xf32, #tpu.memory_space<any>>) dst(%239 : memref<1x128xf32, #tpu.memory_space<vmem>>)
      %c7_i32_184 = arith.constant 7 : i32
      %c0_i32_185 = arith.constant 0 : i32
      %242 = tpu.memref_slice %arg2[%211, %c0_i32_185] : memref<64x128xf32, #tpu.memory_space<any>> -> memref<1x128xf32, #tpu.memory_space<any>>
      %c0_i32_186 = arith.constant 0 : i32
      %243 = tpu.memref_slice %arg8[%213, %c0_i32_186] : memref<16x128xf32, #tpu.memory_space<vmem>> -> memref<1x128xf32, #tpu.memory_space<vmem>>
      %244 = tpu.memref_slice %arg9[%129, %c7_i32_184] : memref<2x8x!tpu.dma_semaphore, #tpu.memory_space<semaphore_mem>> -> memref<1x1x!tpu.dma_semaphore, #tpu.memory_space<semaphore_mem>>
      %245 = tpu.memref_squeeze %244 : memref<1x1x!tpu.dma_semaphore, #tpu.memory_space<semaphore_mem>> -> memref<!tpu.dma_semaphore, #tpu.memory_space<semaphore_mem>>
      tpu.wait_dma2 semaphore(%245 : memref<!tpu.dma_semaphore, #tpu.memory_space<semaphore_mem>>) src(%242 : memref<1x128xf32, #tpu.memory_space<any>>) dst(%243 : memref<1x128xf32, #tpu.memory_space<vmem>>)
      %c8_i32_187 = arith.constant 8 : i32
      %246 = arith.muli %129, %c8_i32_187 : i32
      %247 = tpu.assume_multiple %246, 8 : i32
      %248 = arith.index_cast %247 : i32 to index
      %c0_188 = arith.constant 0 : index
      %249 = vector.load %arg8[%248, %c0_188] : memref<16x128xf32, #tpu.memory_space<vmem>>, vector<8x128xf32>
      %cst_189 = arith.constant dense<0.000000e+00> : vector<128xf32>
      %250 = vector.multi_reduction <add>, %249, %cst_189 [0] : vector<8x128xf32> to vector<128xf32>
      %251 = vector.shape_cast %250 : vector<128xf32> to vector<1x128xf32>
      %cst_190 = arith.constant 1.250000e-01 : f32
      %252 = vector.broadcast %cst_190 : f32 to vector<1x128xf32>
      %253 = arith.mulf %251, %252 : vector<1x128xf32>
      %254 = arith.index_cast %arg11 : i32 to index
      %c0_191 = arith.constant 0 : index
      %255 = vector.load %arg10[%254, %c0_191] : memref<8x128xf32, #tpu.memory_space<vmem>>, vector<1x128xf32>
      tpu.vector_store %arg10[%254, %c0_191], %253 {strides = array<i32>} : memref<8x128xf32, #tpu.memory_space<vmem>>, vector<1x128xf32>,
    }
    %c0 = arith.constant 0 : index
    %c0_86 = arith.constant 0 : index
    %104 = vector.load %arg10[%c0, %c0_86] : memref<8x128xf32, #tpu.memory_space<vmem>>, vector<8x128xf32>
    %105 = arith.truncf %104 : vector<8x128xf32> to vector<8x128xbf16>
    %c0_87 = arith.constant 0 : index
    %c0_88 = arith.constant 0 : index
    %106 = vector.load %arg3[%c0_87, %c0_88] : memref<128x128xbf16, #tpu.memory_space<vmem>>, vector<128x128xbf16>
    %cst = arith.constant dense<0.000000e+00> : vector<8x128xf32>
    %107 = tpu.matmul %105, %106, %cst {dimension_numbers = #tpu.dot_dimension_numbers<[1], [0], [0], [1], [0, 0, 1, 1], [], []>} : vector<8x128xbf16>, vector<128x128xbf16>, vector<8x128xf32> -> vector<8x128xf32>
    %c0_89 = arith.constant 0 : index
    %c0_90 = arith.constant 0 : index
    %108 = vector.load %arg4[%c0_89, %c0_90] : memref<1x128xf32, #tpu.memory_space<vmem>>, vector<1x128xf32>
    %109 = vector.broadcast %108 : vector<1x128xf32> to vector<8x128xf32>
    %110 = arith.addf %107, %109 : vector<8x128xf32>
    %cst_91 = arith.constant 0.000000e+00 : f32
    %111 = vector.broadcast %cst_91 : f32 to vector<8x128xf32>
    %112 = arith.maximumf %110, %111 : vector<8x128xf32>
    %113 = arith.truncf %112 : vector<8x128xf32> to vector<8x128xbf16>
    %c0_92 = arith.constant 0 : index
    %c0_93 = arith.constant 0 : index
    %114 = vector.load %arg5[%c0_92, %c0_93] : memref<128x128xbf16, #tpu.memory_space<vmem>>, vector<128x128xbf16>
    %cst_94 = arith.constant dense<0.000000e+00> : vector<8x128xf32>
    %115 = tpu.matmul %113, %114, %cst_94 {dimension_numbers = #tpu.dot_dimension_numbers<[1], [0], [0], [1], [0, 0, 1, 1], [], []>} : vector<8x128xbf16>, vector<128x128xbf16>, vector<8x128xf32> -> vector<8x128xf32>
    %c0_95 = arith.constant 0 : index
    %c0_96 = arith.constant 0 : index
    %116 = vector.load %arg6[%c0_95, %c0_96] : memref<1x128xf32, #tpu.memory_space<vmem>>, vector<1x128xf32>
    %117 = vector.broadcast %116 : vector<1x128xf32> to vector<8x128xf32>
    %118 = arith.addf %115, %117 : vector<8x128xf32>
    %c0_97 = arith.constant 0 : index
    %c0_98 = arith.constant 0 : index
    %119 = vector.load %arg7[%c0_97, %c0_98] : memref<8x128xf32, #tpu.memory_space<vmem>>, vector<8x128xf32>
    tpu.vector_store %arg7[%c0_97, %c0_98], %118 {strides = array<i32>} : memref<8x128xf32, #tpu.memory_space<vmem>>, vector<8x128xf32>,
    return
  }
  func.func @transform_1(%arg0: i32, %arg1: memref<64xi32, #tpu.memory_space<smem>>) -> (i32, i32) {
    %c0_i32 = arith.constant 0 : i32
    %c0_i32_0 = arith.constant 0 : i32
    %c0_i32_1 = arith.constant 0 : i32
    return %c0_i32, %c0_i32_0 : i32, i32
  }
  func.func @transform_2(%arg0: i32, %arg1: memref<64xi32, #tpu.memory_space<smem>>) -> (i32, i32) {
    %c0_i32 = arith.constant 0 : i32
    %c0_i32_0 = arith.constant 0 : i32
    %c0_i32_1 = arith.constant 0 : i32
    return %c0_i32, %c0_i32_0 : i32, i32
  }
  func.func @transform_3(%arg0: i32, %arg1: memref<64xi32, #tpu.memory_space<smem>>) -> (i32, i32) {
    %c0_i32 = arith.constant 0 : i32
    %c0_i32_0 = arith.constant 0 : i32
    %c0_i32_1 = arith.constant 0 : i32
    return %c0_i32, %c0_i32_0 : i32, i32
  }
  func.func @transform_4(%arg0: i32, %arg1: memref<64xi32, #tpu.memory_space<smem>>) -> (i32, i32) {
    %c0_i32 = arith.constant 0 : i32
    %c0_i32_0 = arith.constant 0 : i32
    %c0_i32_1 = arith.constant 0 : i32
    return %c0_i32, %c0_i32_0 : i32, i32
  }
  func.func @transform_5(%arg0: i32, %arg1: memref<64xi32, #tpu.memory_space<smem>>) -> (i32, i32) {
    %c0_i32 = arith.constant 0 : i32
    %c0_i32_0 = arith.constant 0 : i32
    return %arg0, %c0_i32 : i32, i32
  }
}

</mosaic_0001>

<bundles_post_ra>
// kernel: tpu_custom_call.1
= control target key start
LH: loop header
LB: loop body
LE: loop exit
PB: predicated region body
PF: predicated region fallthrough
CT: control target
= control target key end

     0   :  { %s2397_s0 = inlined_call_operand.hbm [shape: s32[64], index: 0, kind: input, shape index: {}]   ;;  %s2398_s1 = inlined_call_operand.hbm [shape: f32[64,128], index: 1, kind: input, shape index: {}]   ;;  %s2399_s2 = inlined_call_operand.hbm [shape: bf16[128,128], index: 2, kind: input, shape index: {}]   ;;  %s2400_s3 = inlined_call_operand.vmem [shape: f32[1,128], index: 3, kind: input, shape index: {}]   ;;  %s2401_s4 = inlined_call_operand.hbm [shape: bf16[128,128], index: 4, kind: input, shape index: {}]   ;;  %s2402_s5 = inlined_call_operand.vmem [shape: f32[1,128], index: 5, kind: input, shape index: {}]   ;;  %s2403_s6 = inlined_call_operand.hbm [shape: f32[8,128], index: 6, kind: output, shape index: {}]  }
   0x1   :  { %s1283_s23 = scalar_lea.hbm %s2397_s0, 16 }
   0x2   :  { %p1284_p0 = scmp.ne.s32.totalorder %s2397_s0, %s1283_s23  ;;  %p1287_p1 = scmp.lt.u32.totalorder %s1283_s23, %s2397_s0 }
   0x4   :  { %p1289_p2 = pnand %p1287_p1, %p1284_p0 }
   0x6   :  { %1292 = shalt.err (!%p1289_p2)  }
   0x7   :  { %s1807_s28 = smov [#allocation6]  }
   0x8   :  { %12 = dma.hbm_to_smem %s2397_s0, 16, %s1807_s28, [#allocation5] }
   0x9   :  { %1779 = dma.done.wait [#allocation5], 16 }
   0xa   :  { %1780 = vsyncadd [#allocation5], 4294967280 }
   0xb   :  { %14 = sfence }
   0xc   :  { %15 = vsyncpa [#allocation8], 0 }
   0xd   :  { %16 = vsyncpa [#allocation11], 0 }
   0xe   :  { %17 = vsyncpa [#allocation9], 0  ;;  %s1808_s7 = smov [#allocation7]   ;;  %s1293_s11 = scalar_lea.hbm %s2399_s2, 1024 }
   0xf   :  { %s23_s8 = sshll.u32 %s1808_s7, 4  ;;  %p1294_p3 = scmp.ne.s32.totalorder %s2399_s2, %s1293_s11  ;;  %s24_s8 = int_to_ptr.vmem [resolvable:$true] %s23_s8 }
  0x10   :  { %p1297_p4 = scmp.lt.u32.totalorder %s1293_s11, %s2399_s2 }
  0x12   :  { %p1299_p5 = pnand %p1297_p4, %p1294_p3 }
  0x14   :  { %1302 = shalt.err (!%p1299_p5)
}
  0x15   :  { %s1303_s0 = scalar_lea.vmem %s24_s8, 1024  ;;  %p1308_p7 = scmp.lt.s32.totalorder %s24_s8, %s24_s8 }
  0x16   :  { %p1304_p6 = scmp.ne.s32.totalorder %s24_s8, %s1303_s0  ;;  %p1309_p8 = scmp.lt.s32.totalorder %s1303_s0, %s1303_s0 }
  0x18   :  { %p1310_p9 = por %p1309_p8, %p1308_p7 }
  0x1a   :  { %p1311_p10 = pnand %p1310_p9, %p1304_p6 }
  0x1c   :  { %1314 = shalt.err (!%p1311_p10)
}
  0x1d   :  { %s1809_s16 = smov 64   ;;  %s1810_s17 = smov 4  }
  0x1e   :  { %29 = dma.hbm_to_vmem [thread:$0]  %s2399_s2, 1024, %s24_s8, [#allocation8], %s1809_s16, %s1809_s16, %s1810_s17  }
  0x1f   :  { %s1811_s20 = smov [#allocation10]   ;;  %s1315_s24 = scalar_lea.hbm %s2401_s4, 1024 }
  0x20   :  { %s37_s21 = sshll.u32 %s1811_s20, 4  ;;  %p1316_p11 = scmp.ne.s32.totalorder %s2401_s4, %s1315_s24  ;;  %s38_s21 = int_to_ptr.vmem [resolvable:$true] %s37_s21 }
  0x21   :  { %p1319_p12 = scmp.lt.u32.totalorder %s1315_s24, %s2401_s4 }
  0x23   :  { %p1321_p13 = pnand %p1319_p12, %p1316_p11 }
  0x25   :  { %1324 = shalt.err (!%p1321_p13)
}
  0x26   :  { %s1325_s29 = scalar_lea.vmem %s38_s21, 1024  ;;  %p1330_p1 = scmp.lt.s32.totalorder %s38_s21, %s38_s21 }
  0x27   :  { %p1326_p0 = scmp.ne.s32.totalorder %s38_s21, %s1325_s29  ;;  %p1331_p2 = scmp.lt.s32.totalorder %s1325_s29, %s1325_s29 }
  0x29   :  { %p1332_p3 = por %p1331_p2, %p1330_p1 }
  0x2b   :  { %p1333_p4 = pnand %p1332_p3, %p1326_p0 }
  0x2d   :  { %1336 = shalt.err (!%p1333_p4)
}
  0x2e   :  { %43 = dma.hbm_to_vmem [thread:$0]  %s2401_s4, 1024, %s38_s21, [#allocation11], %s1809_s16, %s1809_s16, %s1810_s17  }
  0x2f   :  { %1781 = dma.done.wait [#allocation8], 1024  }
  0x30   :  { %1782 = vsyncadd [#allocation8], 4294966272 }
  0x31   :  { %1783 = dma.done.wait [#allocation11], 1024  }
  0x32   :  { %1784 = vsyncadd [#allocation11], 4294966272  ;;  %s58_s7 = sld [smem:[#allocation6]]  ;;  %s1812_s8 = smov [#allocation2]   ;;  %v1813_v0 = vmov 0.0  }
  0x33   :  { %s72_s9 = sshll.u32 %s1812_s8, 4  ;;  %227 = vst [vmem:[#allocation4] sm:$0xff] %v1813_v0  ;;  %s966_s10 = sld [smem:[#allocation6 + $0x1]]  ;;  %s1895_s9 = int_to_ptr.vmem [resolvable:$true] %s72_s9 }
  0x34   :  { %s1814_s11 = smov [#allocation2 + $0x1]   ;;  %s1897_s13 = sld [smem:[#allocation6 + $0x2]] }
  0x35   :  { %s93_s12 = sshll.u32 %s1814_s11, 4  ;;  %s1815_s4 = smov [#allocation2 + $0x2]   ;;  %s1899_s12 = int_to_ptr.vmem [resolvable:$true] %s93_s12 }
  0x36   :  { %s114_s14 = sshll.u32 %s1815_s4, 4  ;;  %s1901_s15 = sld [smem:[#allocation6 + $0x3]]  ;;  %s1903_s14 = int_to_ptr.vmem [resolvable:$true] %s114_s14 }
  0x37   :  { %s1912_s23 = scalar_lea.hbm %s2398_s1, 1024 }
  0x38   :  { %p59_p5 = scmp.gt.s32.totalorder %s58_s7, 0  ;;  %p960_p6 = scmp.lt.s32.totalorder %s58_s7, 63 }
  0x39   :  { %p78_p7 = scmp.gt.s32.totalorder %s966_s10, 0  ;;  %p967_p8 = scmp.lt.s32.totalorder %s966_s10, 63 }
  0x3a   :  { %s2413_s7 = smov (!%p59_p5, %s58_s7), 0  ;;  %p99_p9 = scmp.gt.s32.totalorder %s1897_s13, 0 }
  0x3b   :  { %s2415_s10 = smov (!%p78_p7, %s966_s10), 0  ;;  %s2417_s7 = smov (!%p960_p6, %s2413_s7), 63 }
  0x3c   :  { %s2419_s10 = smov (!%p967_p8, %s2415_s10), 63  ;;  %s965_s0 = sshll.u32 %s2417_s7, 4 }
  0x3d   :  { %s64_s18 = scalar_lea.hbm %s2398_s1, %s965_s0  ;;  %s972_s19 = sshll.u32 %s2419_s10, 4 }
  0x3e   :  { %s1337_s20 = scalar_lea.hbm %s64_s18, 16  ;;  %p1340_p11 = scmp.lt.u32.totalorder %s64_s18, %s2398_s1 }
  0x3f   :  { %p1338_p10 = scmp.ne.s32.totalorder %s64_s18, %s1337_s20  ;;  %p1341_p12 = scmp.lt.u32.totalorder %s1912_s23, %s1337_s20 }
  0x40   :  { %p1343_p0 = scmp.lt.u32.totalorder %s1337_s20, %s64_s18 }
  0x41   :  { %p1342_p13 = por %p1341_p12, %p1340_p11 }
  0x43   :  { %p1344_p1 = por %p1343_p0, %p1342_p13 }
  0x45   :  { %p1345_p2 = pnand %p1344_p1, %p1338_p10 }
  0x47   :  { %1348 = shalt.err (!%p1345_p2)  }
  0x48   :  { %s1349_s26 = scalar_lea.vmem %s1895_s9, 16  ;;  %s1921_s27 = scalar_lea.vmem %s1895_s9, 256 }
  0x49   :  { %p1350_p3 = scmp.ne.s32.totalorder %s1895_s9, %s1349_s26  ;;  %p1354_p4 = scmp.lt.s32.totalorder %s1895_s9, %s1895_s9 }
  0x4a   :  { %p1355_p5 = scmp.lt.s32.totalorder %s1921_s27, %s1349_s26 }
  0x4c   :  { %p1356_p6 = por %p1355_p5, %p1354_p4 }
  0x4e   :  { %p1357_p7 = pnand %p1356_p6, %p1350_p3 }
  0x50   :  { %1360 = shalt.err (!%p1357_p7)  }
  0x51   :  { %75 = dma.hbm_to_vmem [thread:$0]  %s64_s18, 16, %s1895_s9, [#allocation3] }
  0x52   :  { %s83_s2 = scalar_lea.hbm %s2398_s1, %s972_s19  ;;  %p974_p8 = scmp.lt.s32.totalorder %s1897_s13, 63 }
  0x53   :  { %s1361_s30 = scalar_lea.hbm %s83_s2, 16  ;;  %p1364_p11 = scmp.lt.u32.totalorder %s83_s2, %s2398_s1 }
  0x54   :  { %p1362_p10 = scmp.ne.s32.totalorder %s83_s2, %s1361_s30  ;;  %p1365_p12 = scmp.lt.u32.totalorder %s1912_s23, %s1361_s30 }
  0x55   :  { %p1367_p0 = scmp.lt.u32.totalorder %s1361_s30, %s83_s2 }
  0x56   :  { %p1366_p13 = por %p1365_p12, %p1364_p11 }
  0x58   :  { %p1368_p1 = por %p1367_p0, %p1366_p13 }
  0x5a   :  { %p1369_p2 = pnand %p1368_p1, %p1362_p10 }
  0x5c   :  { %1372 = shalt.err (!%p1369_p2)  }
  0x5d   :  { %s1373_s10 = scalar_lea.vmem %s1899_s12, 16  ;;  %p1378_p4 = scmp.lt.s32.totalorder %s1899_s12, %s1895_s9 }
  0x5e   :  { %p1374_p3 = scmp.ne.s32.totalorder %s1899_s12, %s1373_s10  ;;  %p1379_p5 = scmp.lt.s32.totalorder %s1921_s27, %s1373_s10 }
  0x60   :  { %p1380_p6 = por %p1379_p5, %p1378_p4 }
  0x62   :  { %p1381_p7 = pnand %p1380_p6, %p1374_p3 }
  0x64   :  { %1384 = shalt.err (!%p1381_p7)  }
  0x65   :  { %96 = dma.hbm_to_vmem [thread:$0]  %s83_s2, 16, %s1899_s12, [#allocation3 + $0x1] }
  0x66   :  { %s100_s11 = scalar_select %p99_p9, %s1897_s13, 0 }
  0x67   :  { %p120_p10 = scmp.gt.s32.totalorder %s1901_s15, 0  ;;  %p981_p11 = scmp.lt.s32.totalorder %s1901_s15, 63 }
  0x68   :  { %s2421_s11 = smov (!%p974_p8, %s100_s11), 63  ;;  %s1816_s16 = smov [#allocation2 + $0x3]  }
  0x69   :  { %s121_s4 = scalar_select %p120_p10, %s1901_s15, 0 }
  0x6a   :  { %s979_s0 = sshll.u32 %s2421_s11, 4  ;;  %s135_s17 = sshll.u32 %s1816_s16, 4  ;;  %s1952_s17 = int_to_ptr.vmem [resolvable:$true] %s135_s17 }
  0x6b   :  { %s104_s20 = scalar_lea.hbm %s2398_s1, %s979_s0 }
  0x6c   :  { %s1385_s21 = scalar_lea.hbm %s104_s20, 16  ;;  %p1388_p9 = scmp.lt.u32.totalorder %s104_s20, %s2398_s1 }
  0x6d   :  { %p1386_p12 = scmp.ne.s32.totalorder %s104_s20, %s1385_s21  ;;  %p1389_p13 = scmp.lt.u32.totalorder %s1912_s23, %s1385_s21 }
  0x6e   :  { %p1391_p1 = scmp.lt.u32.totalorder %s1385_s21, %s104_s20 }
  0x6f   :  { %p1390_p0 = por %p1389_p13, %p1388_p9 }
  0x71   :  { %p1392_p8 = por %p1391_p1, %p1390_p0 }
  0x73   :  { %p1393_p2 = pnand %p1392_p8, %p1386_p12 }
  0x75   :  { %1396 = shalt.err (!%p1393_p2)  }
  0x76   :  { %s1397_s13 = scalar_lea.vmem %s1903_s14, 16  ;;  %p1402_p4 = scmp.lt.s32.totalorder %s1903_s14, %s1895_s9 }
  0x77   :  { %p1398_p3 = scmp.ne.s32.totalorder %s1903_s14, %s1397_s13  ;;  %p1403_p5 = scmp.lt.s32.totalorder %s1921_s27, %s1397_s13 }
  0x79   :  { %p1404_p6 = por %p1403_p5, %p1402_p4 }
  0x7b   :  { %p1405_p7 = pnand %p1404_p6, %p1398_p3 }
  0x7d   :  { %1408 = shalt.err (!%p1405_p7)  }
  0x7e   :  { %117 = dma.hbm_to_vmem [thread:$0]  %s104_s20, 16, %s1903_s14, [#allocation3 + $0x2] }
  0x7f   :  { %s2423_s4 = smov (!%p981_p11, %s121_s4), 63  ;;  %s1966_s24 = sld [smem:[#allocation6 + $0x4]] }
  0x80   :  { %s986_s25 = sshll.u32 %s2423_s4, 4  ;;  %s1817_s26 = smov [#allocation2 + $0x4]  }
  0x81   :  { %s156_s28 = sshll.u32 %s1817_s26, 4  ;;  %s125_s30 = scalar_lea.hbm %s2398_s1, %s986_s25  ;;  %s1971_s28 = int_to_ptr.vmem [resolvable:$true] %s156_s28 }
  0x82   :  { %s1409_s7 = scalar_lea.hbm %s125_s30, 16  ;;  %p1412_p12 = scmp.lt.u32.totalorder %s125_s30, %s2398_s1 }
  0x83   :  { %p1410_p10 = scmp.ne.s32.totalorder %s125_s30, %s1409_s7  ;;  %p1413_p9 = scmp.lt.u32.totalorder %s1912_s23, %s1409_s7 }
  0x84   :  { %p1415_p11 = scmp.lt.u32.totalorder %s1409_s7, %s125_s30 }
  0x85   :  { %p1414_p13 = por %p1413_p9, %p1412_p12 }
  0x87   :  { %p1416_p0 = por %p1415_p11, %p1414_p13 }
  0x89   :  { %p1417_p1 = pnand %p1416_p0, %p1410_p10 }
  0x8b   :  { %1420 = shalt.err (!%p1417_p1)  }
  0x8c   :  { %s1421_s14 = scalar_lea.vmem %s1952_s17, 16  ;;  %p1426_p2 = scmp.lt.s32.totalorder %s1952_s17, %s1895_s9 }
  0x8d   :  { %p1422_p8 = scmp.ne.s32.totalorder %s1952_s17, %s1421_s14  ;;  %p1427_p3 = scmp.lt.s32.totalorder %s1921_s27, %s1421_s14 }
  0x8f   :  { %p1428_p4 = por %p1427_p3, %p1426_p2 }
  0x91   :  { %p1429_p5 = pnand %p1428_p4, %p1422_p8 }
  0x93   :  { %1432 = shalt.err (!%p1429_p5)  }
  0x94   :  { %138 = dma.hbm_to_vmem [thread:$0]  %s125_s30, 16, %s1952_s17, [#allocation3 + $0x3] }
  0x95   :  { %s1983_s15 = sld [smem:[#allocation6 + $0x5]]  ;;  %s1818_s11 = smov [#allocation2 + $0x5]  }
  0x96   :  { %s177_s4 = sshll.u32 %s1818_s11, 4  ;;  %s1985_s0 = sld [smem:[#allocation6 + $0x6]]  ;;  %s1989_s4 = int_to_ptr.vmem [resolvable:$true] %s177_s4 }
  0x97   :  { %p141_p6 = scmp.gt.s32.totalorder %s1966_s24, 0  ;;  %p988_p7 = scmp.lt.s32.totalorder %s1966_s24, 63 }
  0x98   :  { %s1819_s16 = smov [#allocation2 + $0x6]   ;;  %s1994_s17 = sld [smem:[#allocation6 + $0x7]] }
  0x99   :  { %s2425_s24 = smov (!%p141_p6, %s1966_s24), 0  ;;  %s1992_s18 = sshll.u32 %s1819_s16, 4  ;;  %s2024_s18 = int_to_ptr.vmem [resolvable:$true] %s1992_s18 }
  0x9a   :  { %s2427_s24 = smov (!%p988_p7, %s2425_s24), 63 }
  0x9b   :  { %p162_p10 = scmp.gt.s32.totalorder %s1983_s15, 0  ;;  %s993_s19 = sshll.u32 %s2427_s24, 4 }
  0x9c   :  { %p183_p9 = scmp.gt.s32.totalorder %s1985_s0, 0  ;;  %s146_s22 = scalar_lea.hbm %s2398_s1, %s993_s19 }
  0x9d   :  { %s1433_s12 = scalar_lea.hbm %s146_s22, 16  ;;  %p1436_p0 = scmp.lt.u32.totalorder %s146_s22, %s2398_s1 }
  0x9e   :  { %p1434_p11 = scmp.ne.s32.totalorder %s146_s22, %s1433_s12  ;;  %p1437_p1 = scmp.lt.u32.totalorder %s1912_s23, %s1433_s12 }
  0x9f   :  { %p1439_p2 = scmp.lt.u32.totalorder %s1433_s12, %s146_s22 }
  0xa0   :  { %p1438_p8 = por %p1437_p1, %p1436_p0 }
  0xa2   :  { %p1440_p3 = por %p1439_p2, %p1438_p8 }
  0xa4   :  { %p1441_p4 = pnand %p1440_p3, %p1434_p11 }
  0xa6   :  { %1444 = shalt.err (!%p1441_p4)  }
  0xa7   :  { %s1445_s24 = scalar_lea.vmem %s1971_s28, 16  ;;  %p1450_p6 = scmp.lt.s32.totalorder %s1971_s28, %s1895_s9 }
  0xa8   :  { %p1446_p5 = scmp.ne.s32.totalorder %s1971_s28, %s1445_s24  ;;  %p1451_p7 = scmp.lt.s32.totalorder %s1921_s27, %s1445_s24 }
  0xaa   :  { %p1452_p13 = por %p1451_p7, %p1450_p6 }
  0xac   :  { %p1453_p12 = pnand %p1452_p13, %p1446_p5 }
  0xae   :  { %1456 = shalt.err (!%p1453_p12)  }
  0xaf   :  { %159 = dma.hbm_to_vmem [thread:$0]  %s146_s22, 16, %s1971_s28, [#allocation3 + $0x4] }
  0xb0   :  { %s163_s26 = scalar_select %p162_p10, %s1983_s15, 0 }
  0xb1   :  { %s184_s29 = scalar_select %p183_p9, %s1985_s0, 0 }
  0xb2   :  { %p2404_p11 = scmp.lt.s32.totalorder %s1983_s15, 63  ;;  %p2405_p0 = scmp.lt.s32.totalorder %s1985_s0, 63 }
  0xb4   :  { %s2429_s26 = smov (!%p2404_p11, %s163_s26), 63  ;;  %s2431_s29 = smov (!%p2405_p0, %s184_s29), 63 }
  0xb5   :  { %s1000_s2 = sshll.u32 %s2429_s26, 4  ;;  %s1007_s10 = sshll.u32 %s2431_s29, 4 }
  0xb6   :  { %s167_s8 = scalar_lea.hbm %s2398_s1, %s1000_s2 }
  0xb7   :  { %s1457_s14 = scalar_lea.hbm %s167_s8, 16  ;;  %p1460_p10 = scmp.lt.u32.totalorder %s167_s8, %s2398_s1 }
  0xb8   :  { %p1458_p12 = scmp.ne.s32.totalorder %s167_s8, %s1457_s14  ;;  %p1461_p13 = scmp.lt.u32.totalorder %s1912_s23, %s1457_s14 }
  0xb9   :  { %p1463_p1 = scmp.lt.u32.totalorder %s1457_s14, %s167_s8 }
  0xba   :  { %p1462_p9 = por %p1461_p13, %p1460_p10 }
  0xbc   :  { %p1464_p8 = por %p1463_p1, %p1462_p9 }
  0xbe   :  { %p1465_p2 = pnand %p1464_p8, %p1458_p12 }
  0xc0   :  { %1468 = shalt.err (!%p1465_p2)  }
  0xc1   :  { %s1469_s15 = scalar_lea.vmem %s1989_s4, 16  ;;  %p1474_p4 = scmp.lt.s32.totalorder %s1989_s4, %s1895_s9 }
  0xc2   :  { %p1470_p3 = scmp.ne.s32.totalorder %s1989_s4, %s1469_s15  ;;  %p1475_p5 = scmp.lt.s32.totalorder %s1921_s27, %s1469_s15 }
  0xc4   :  { %p1476_p6 = por %p1475_p5, %p1474_p4 }
  0xc6   :  { %p1477_p7 = pnand %p1476_p6, %p1470_p3 }
  0xc8   :  { %1480 = shalt.err (!%p1477_p7)  }
  0xc9   :  { %180 = dma.hbm_to_vmem [thread:$0]  %s167_s8, 16, %s1989_s4, [#allocation3 + $0x5] }
  0xca   :  { %s188_s19 = scalar_lea.hbm %s2398_s1, %s1007_s10  ;;  %p204_p11 = scmp.gt.s32.totalorder %s1994_s17, 0 }
  0xcb   :  { %s1481_s20 = scalar_lea.hbm %s188_s19, 16  ;;  %p1484_p12 = scmp.lt.u32.totalorder %s188_s19, %s2398_s1 }
  0xcc   :  { %p1482_p0 = scmp.ne.s32.totalorder %s188_s19, %s1481_s20  ;;  %p1485_p10 = scmp.lt.u32.totalorder %s1912_s23, %s1481_s20 }
  0xcd   :  { %p1487_p9 = scmp.lt.u32.totalorder %s1481_s20, %s188_s19 }
  0xce   :  { %p1486_p13 = por %p1485_p10, %p1484_p12 }
  0xd0   :  { %p1488_p1 = por %p1487_p9, %p1486_p13 }
  0xd2   :  { %p1489_p8 = pnand %p1488_p1, %p1482_p0 }
  0xd4   :  { %1492 = shalt.err (!%p1489_p8)  }
  0xd5   :  { %s1493_s4 = scalar_lea.vmem %s2024_s18, 16  ;;  %p1498_p3 = scmp.lt.s32.totalorder %s2024_s18, %s1895_s9 }
  0xd6   :  { %p1494_p2 = scmp.ne.s32.totalorder %s2024_s18, %s1493_s4  ;;  %p1499_p4 = scmp.lt.s32.totalorder %s1921_s27, %s1493_s4 }
  0xd8   :  { %p1500_p5 = por %p1499_p4, %p1498_p3 }
  0xda   :  { %p1501_p6 = pnand %p1500_p5, %p1494_p2 }
  0xdc   :  { %1504 = shalt.err (!%p1501_p6)  }
  0xdd   :  { %201 = dma.hbm_to_vmem [thread:$0]  %s188_s19, 16, %s2024_s18, [#allocation3 + $0x6] }
  0xde   :  { %s205_s12 = scalar_select %p204_p11, %s1994_s17, 0 }
  0xdf   :  { %p1009_p7 = scmp.lt.s32.totalorder %s1994_s17, 63  ;;  %s1820_s13 = smov [#allocation2 + $0x7]  }
  0xe0   :  { %s219_s25 = sshll.u32 %s1820_s13, 4  ;;  %s220_s25 = int_to_ptr.vmem [resolvable:$true] %s219_s25 }
  0xe1   :  { %s2433_s12 = smov (!%p1009_p7, %s205_s12), 63 }
  0xe2   :  { %s1014_s24 = sshll.u32 %s2433_s12, 4 }
  0xe3   :  { %s209_s2 = scalar_lea.hbm %s2398_s1, %s1014_s24 }
  0xe4   :  { %s1505_s30 = scalar_lea.hbm %s209_s2, 16  ;;  %p1508_p12 = scmp.lt.u32.totalorder %s209_s2, %s2398_s1 }
  0xe5   :  { %p1506_p0 = scmp.ne.s32.totalorder %s209_s2, %s1505_s30  ;;  %p1509_p10 = scmp.lt.u32.totalorder %s1912_s23, %s1505_s30 }
  0xe6   :  { %p1511_p9 = scmp.lt.u32.totalorder %s1505_s30, %s209_s2 }
  0xe7   :  { %p1510_p13 = por %p1509_p10, %p1508_p12 }
  0xe9   :  { %p1512_p11 = por %p1511_p9, %p1510_p13 }
  0xeb   :  { %p1513_p1 = pnand %p1512_p11, %p1506_p0 }
  0xed   :  { %1516 = shalt.err (!%p1513_p1)  }
  0xee   :  { %s1517_s18 = scalar_lea.vmem %s220_s25, 16  ;;  %p1522_p2 = scmp.lt.s32.totalorder %s220_s25, %s1895_s9 }
  0xef   :  { %p1518_p8 = scmp.ne.s32.totalorder %s220_s25, %s1517_s18  ;;  %p1523_p3 = scmp.lt.s32.totalorder %s1921_s27, %s1517_s18 }
  0xf1   :  { %p1524_p4 = por %p1523_p3, %p1522_p2 }
  0xf3   :  { %p1525_p5 = pnand %p1524_p4, %p1518_p8 }
  0xf5   :  { %1528 = shalt.err (!%p1525_p5)  }
  0xf6   :  { %222 = dma.hbm_to_vmem [thread:$0]  %s209_s2, 16, %s220_s25, [#allocation3 + $0x7] }
  0xf7   :  { %s2066_s17 = smov 0  }
  0xf8 LB: > { %p234_p6 = scmp.lt.s32.totalorder %s1805_s17, 0  ;;  %s235_s10 = ssub.s32 0, %s1805_s17  ;;  %s1805_s17 = sphi %s2066_s17, %s2410_s17  }
  0xf9   : > { %s1015_s14 = smin.u32 %s1805_s17, %s235_s10  ;;  %s2075_s11 = sadd.s32 1, %s1805_s17  }
  0xfa   : > { %s237_s28 = sand.u32 1, %s1015_s14   ;;  %p1242_p0 = scmp.lt.s32.totalorder %s2075_s11, 2 }
  0xfb   : > { %s238_s15 = ssub.s32 0, %s237_s28  ;;  %s1141_s0 = sshll.u32 %s1805_s17, 3 }
  0xfc   : > { %s2435_s15 = smov (!%p234_p6, %s238_s15), %s237_s28  ;;  %s2080_s19 = sadd.s32 8, %s1141_s0 }
  0xfd   : > { %p1017_p12 = scmp.lt.s32.totalorder %s2435_s15, 0  ;;  %s244_s16 = sadd.s32 2, %s2435_s15 }
  0xfe   : > { %s1218_s20 = scalar_select %p1242_p0, [#allocation6], [#allocation47] }
  0xff   : > { %s2437_s16 = smov (!%p1017_p12, %s244_s16), %s2435_s15  ;;  %s275_s26 = sadd.s32 1, %s2080_s19 }
 0x100   : > { %s251_s21 = ssub.s32 1, %s2437_s16  ;;  %s1083_s22 = sshll.u32 %s2437_s16, 3 }
 0x101   : > { %s1219_s4 = scalar_select %p1242_p0, %s2080_s19, 0 }
 0x102   : > { %s1025_s12 = sshll.u32 %s251_s21, 3  ;;  %s2439_s26 = smov (!%p1242_p0, %s275_s26), 0 }
 0x103   : > { %s254_s13 = sld [smem:[%s1218_s20 + %s1219_s4]]  ;;  %s2091_s25 = scalar_lea.vmem [#allocation2], %s1025_s12 }
 0x104   : > { %s271_s24 = sshll.u32 %s2091_s25, 4  ;;  %s877_s2 = scalar_lea.vmem %s2091_s25, 1 [#allocation2]  ;;  %s2100_s24 = int_to_ptr.vmem [resolvable:$true] %s271_s24 }
 0x105   : > { %s1221_s29 = scalar_select %p1242_p0, [#allocation6], [#allocation48] }
 0x106   : > { %s2104_s7 = scalar_lea.sflag [#allocation3], %s1025_s12  ;;  %s2107_s18 = sshll.u32 %s877_s2, 4  ;;  %s295_s18 = int_to_ptr.vmem [resolvable:$true] %s2107_s18 }
 0x107   : > { %s2102_s30 = sld [smem:[%s1221_s29 + %s2439_s26]]  ;;  %s880_s8 = scalar_lea.sflag %s2104_s7, 1 [#allocation3] }
 0x108   : > { %s2111_s10 = scalar_select %p1242_p0, [#allocation6], [#allocation49] }
 0x109   : > { %p255_p10 = scmp.gt.s32.totalorder %s254_s13, 0  ;;  %p1020_p13 = scmp.lt.s32.totalorder %s254_s13, 63 }
 0x10a   : > { %s298_s28 = sadd.s32 2, %s2080_s19 }
 0x10b   : > { %s2441_s13 = smov (!%p255_p10, %s254_s13), 0 }
 0x10c   : > { %s2443_s13 = smov (!%p1020_p13, %s2441_s13), 63 }
 0x10d   : > { %s1026_s14 = sshll.u32 %s2443_s13, 4 }
 0x10e   : > { %s261_s20 = scalar_lea.hbm %s2398_s1, %s1026_s14 }
 0x10f   : > { %s1529_s21 = scalar_lea.hbm %s261_s20, 16  ;;  %p1534_p2 = scmp.lt.u32.totalorder %s261_s20, %s2398_s1 }
 0x110   : > { %p1530_p11 = scmp.ne.s32.totalorder %s261_s20, %s1529_s21  ;;  %p1535_p3 = scmp.lt.u32.totalorder %s1912_s23, %s1529_s21 }
 0x111   : > { %p1537_p5 = scmp.lt.u32.totalorder %s1529_s21, %s261_s20 }
 0x112   : > { %p1531_p1 = pnand %p1530_p11, %p1242_p0  ;;  %p1536_p4 = por %p1535_p3, %p1534_p2 }
 0x114   : > { %p1532_p8 = pneg %p1531_p1  ;;  %p1538_p6 = por %p1537_p5, %p1536_p4 }
 0x116   : > { %p1539_p12 = pnand %p1538_p6, %p1532_p8 }
 0x118   : > { %1542 = shalt.err (!%p1539_p12)  }
 0x119   : > { %s1543_s13 = scalar_lea.vmem %s2100_s24, 16  ;;  %p1550_p1 = scmp.lt.s32.totalorder %s2100_s24, %s1895_s9 }
 0x11a   : > { %p1544_p10 = scmp.ne.s32.totalorder %s2100_s24, %s1543_s13  ;;  %p1551_p7 = scmp.lt.s32.totalorder %s1921_s27, %s1543_s13 }
 0x11c   : > { %p1545_p13 = pnand %p1544_p10, %p1242_p0  ;;  %p1552_p9 = por %p1551_p7, %p1550_p1 }
 0x11e   : > { %p1546_p11 = pneg %p1545_p13 }
 0x120   : > { %p1553_p2 = pnand %p1552_p9, %p1546_p11 }
 0x122   : > { %1556 = shalt.err (!%p1553_p2)  }
 0x123   : > { %1220 = dma.hbm_to_vmem [thread:$0]  (%p1242_p0), %s261_s20, 16, %s2100_s24, %s2104_s7 }
 0x124   : > { %p2406_p8 = scmp.gt.s32.totalorder %s2102_s30, 0  ;;  %p1027_p7 = scmp.lt.s32.totalorder %s2102_s30, 63 }
 0x125   : > { %s885_s29 = scalar_lea.vmem %s2091_s25, 2 [#allocation2]  ;;  %s2445_s28 = smov (!%p1242_p0, %s298_s28), 0 }
 0x126   : > { %s278_s26 = scalar_select %p2406_p8, %s2102_s30, 0 }
 0x127   : > { %s2144_s2 = sld [smem:[%s2111_s10 + %s2445_s28]]  ;;  %s2146_s15 = sshll.u32 %s885_s29, 4  ;;  %s318_s15 = int_to_ptr.vmem [resolvable:$true] %s2146_s15 }
 0x128   : > { %s2447_s26 = smov (!%p1027_p7, %s278_s26), 63  ;;  %s321_s12 = sadd.s32 3, %s2080_s19 }
 0x129   : > { %s1032_s14 = sshll.u32 %s2447_s26, 4 }
 0x12a   : > { %s283_s4 = scalar_lea.hbm %s2398_s1, %s1032_s14 }
 0x12b   : > { %s1557_s24 = scalar_lea.hbm %s283_s4, 16  ;;  %p1562_p5 = scmp.lt.u32.totalorder %s283_s4, %s2398_s1 }
 0x12c   : > { %p1558_p9 = scmp.ne.s32.totalorder %s283_s4, %s1557_s24  ;;  %p1563_p6 = scmp.lt.u32.totalorder %s1912_s23, %s1557_s24 }
 0x12d   : > { %p1565_p10 = scmp.lt.u32.totalorder %s1557_s24, %s283_s4 }
 0x12e   : > { %p1559_p3 = pnand %p1558_p9, %p1242_p0  ;;  %p1564_p12 = por %p1563_p6, %p1562_p5 }
 0x130   : > { %p1560_p4 = pneg %p1559_p3  ;;  %p1566_p13 = por %p1565_p10, %p1564_p12 }
 0x132   : > { %p1567_p11 = pnand %p1566_p13, %p1560_p4 }
 0x134   : > { %1570 = shalt.err (!%p1567_p11)  }
 0x135   : > { %s1571_s10 = scalar_lea.vmem %s295_s18, 16  ;;  %p1578_p7 = scmp.lt.s32.totalorder %s295_s18, %s1895_s9 }
 0x136   : > { %p1572_p1 = scmp.ne.s32.totalorder %s295_s18, %s1571_s10  ;;  %p1579_p9 = scmp.lt.s32.totalorder %s1921_s27, %s1571_s10 }
 0x138   : > { %p1573_p2 = pnand %p1572_p1, %p1242_p0  ;;  %p1580_p3 = por %p1579_p9, %p1578_p7 }
 0x13a   : > { %p1574_p8 = pneg %p1573_p2 }
 0x13c   : > { %p1581_p5 = pnand %p1580_p3, %p1574_p8 }
 0x13e   : > { %1584 = shalt.err (!%p1581_p5)  }
 0x13f   : > { %1223 = dma.hbm_to_vmem [thread:$0]  (%p1242_p0), %s283_s4, 16, %s295_s18, %s880_s8 }
 0x140   : > { %s1227_s28 = scalar_select %p1242_p0, [#allocation6], [#allocation50] }
 0x141   : > { %s2449_s12 = smov (!%p1242_p0, %s321_s12), 0  ;;  %p300_p4 = scmp.gt.s32.totalorder %s2144_s2, 0 }
 0x142   : > { %p1035_p6 = scmp.lt.s32.totalorder %s2144_s2, 63  ;;  %s2172_s13 = sld [smem:[%s1227_s28 + %s2449_s12]] }
 0x143   : > { %s893_s26 = scalar_lea.vmem %s2091_s25, 3 [#allocation2]  ;;  %s2451_s2 = smov (!%p300_p4, %s2144_s2), 0 }
 0x144   : > { %s888_s29 = scalar_lea.sflag %s2104_s7, 2 [#allocation3]  ;;  %s340_s14 = sshll.u32 %s893_s26, 4  ;;  %s2179_s14 = int_to_ptr.vmem [resolvable:$true] %s340_s14 }
 0x145   : > { %s2453_s2 = smov (!%p1035_p6, %s2451_s2), 63  ;;  %s896_s0 = scalar_lea.sflag %s2104_s7, 3 [#allocation3] }
 0x146   : > { %s1040_s21 = sshll.u32 %s2453_s2, 4 }
 0x147   : > { %s306_s4 = scalar_lea.hbm %s2398_s1, %s1040_s21 }
 0x148   : > { %s1585_s24 = scalar_lea.hbm %s306_s4, 16  ;;  %p1590_p1 = scmp.lt.u32.totalorder %s306_s4, %s2398_s1 }
 0x149   : > { %p1586_p10 = scmp.ne.s32.totalorder %s306_s4, %s1585_s24  ;;  %p1591_p2 = scmp.lt.u32.totalorder %s1912_s23, %s1585_s24 }
 0x14a   : > { %p1593_p7 = scmp.lt.u32.totalorder %s1585_s24, %s306_s4 }
 0x14b   : > { %p1587_p13 = pnand %p1586_p10, %p1242_p0  ;;  %p1592_p8 = por %p1591_p2, %p1590_p1 }
 0x14d   : > { %p1588_p11 = pneg %p1587_p13  ;;  %p1594_p9 = por %p1593_p7, %p1592_p8 }
 0x14f   : > { %p1595_p3 = pnand %p1594_p9, %p1588_p11 }
 0x151   : > { %1598 = shalt.err (!%p1595_p3)  }
 0x152   : > { %s1599_s2 = scalar_lea.vmem %s318_s15, 16  ;;  %p1606_p10 = scmp.lt.s32.totalorder %s318_s15, %s1895_s9 }
 0x153   : > { %p1600_p5 = scmp.ne.s32.totalorder %s318_s15, %s1599_s2  ;;  %p1607_p13 = scmp.lt.s32.totalorder %s1921_s27, %s1599_s2 }
 0x155   : > { %p1601_p4 = pnand %p1600_p5, %p1242_p0  ;;  %p1608_p12 = por %p1607_p13, %p1606_p10 }
 0x157   : > { %p1602_p6 = pneg %p1601_p4 }
 0x159   : > { %p1609_p1 = pnand %p1608_p12, %p1602_p6 }
 0x15b   : > { %1612 = shalt.err (!%p1609_p1)  }
 0x15c   : > { %1226 = dma.hbm_to_vmem [thread:$0]  (%p1242_p0), %s306_s4, 16, %s318_s15, %s888_s29 }
 0x15d   : > { %p2407_p11 = scmp.gt.s32.totalorder %s2172_s13, 0  ;;  %p1043_p2 = scmp.lt.s32.totalorder %s2172_s13, 63 }
 0x15e   : > { %s344_s10 = sadd.s32 4, %s2080_s19  ;;  %s901_s21 = scalar_lea.vmem %s2091_s25, 4 [#allocation2] }
 0x15f   : > { %s324_s20 = scalar_select %p2407_p11, %s2172_s13, 0 }
 0x160   : > { %s1230_s28 = scalar_select %p1242_p0, [#allocation6], [#allocation51] }
 0x161   : > { %s2455_s20 = smov (!%p1043_p2, %s324_s20), 63  ;;  %s2457_s10 = smov (!%p1242_p0, %s344_s10), 0 }
 0x162   : > { %s1048_s26 = sshll.u32 %s2455_s20, 4  ;;  %s2212_s12 = sld [smem:[%s1230_s28 + %s2457_s10]] }
 0x163   : > { %s329_s24 = scalar_lea.hbm %s2398_s1, %s1048_s26 }
 0x164   : > { %s1613_s30 = scalar_lea.hbm %s329_s24, 16  ;;  %p1618_p9 = scmp.lt.u32.totalorder %s329_s24, %s2398_s1 }
 0x165   : > { %p1614_p12 = scmp.ne.s32.totalorder %s329_s24, %s1613_s30  ;;  %p1619_p3 = scmp.lt.u32.totalorder %s1912_s23, %s1613_s30 }
 0x166   : > { %p1621_p4 = scmp.lt.u32.totalorder %s1613_s30, %s329_s24 }
 0x167   : > { %p1615_p8 = pnand %p1614_p12, %p1242_p0  ;;  %p1620_p5 = por %p1619_p3, %p1618_p9 }
 0x169   : > { %p1616_p7 = pneg %p1615_p8  ;;  %p1622_p6 = por %p1621_p4, %p1620_p5 }
 0x16b   : > { %p1623_p10 = pnand %p1622_p6, %p1616_p7 }
 0x16d   : > { %1626 = shalt.err (!%p1623_p10)  }
 0x16e   : > { %s1627_s29 = scalar_lea.vmem %s2179_s14, 16  ;;  %p1634_p2 = scmp.lt.s32.totalorder %s2179_s14, %s1895_s9 }
 0x16f   : > { %p1628_p13 = scmp.ne.s32.totalorder %s2179_s14, %s1627_s29  ;;  %p1635_p12 = scmp.lt.s32.totalorder %s1921_s27, %s1627_s29 }
 0x171   : > { %p1629_p1 = pnand %p1628_p13, %p1242_p0  ;;  %p1636_p8 = por %p1635_p12, %p1634_p2 }
 0x173   : > { %p1630_p11 = pneg %p1629_p1 }
 0x175   : > { %p1637_p3 = pnand %p1636_p8, %p1630_p11 }
 0x177   : > { %1640 = shalt.err (!%p1637_p3)  }
 0x178   : > { %1229 = dma.hbm_to_vmem [thread:$0]  (%p1242_p0), %s329_s24, 16, %s2179_s14, %s896_s0 }
 0x179   : > { %s363_s4 = sshll.u32 %s901_s21, 4  ;;  %s367_s2 = sadd.s32 5, %s2080_s19  ;;  %s2240_s4 = int_to_ptr.vmem [resolvable:$true] %s363_s4 }
 0x17a   : > { %s1233_s20 = scalar_select %p1242_p0, [#allocation6], [#allocation52] }
 0x17b   : > { %s2459_s2 = smov (!%p1242_p0, %s367_s2), 0  ;;  %s904_s10 = scalar_lea.sflag %s2104_s7, 4 [#allocation3] }
 0x17c   : > { %p346_p7 = scmp.gt.s32.totalorder %s2212_s12, 0  ;;  %p1051_p9 = scmp.lt.s32.totalorder %s2212_s12, 63 }
 0x17d   : > { %s2242_s28 = sld [smem:[%s1233_s20 + %s2459_s2]]  ;;  %s909_s26 = scalar_lea.vmem %s2091_s25, 5 [#allocation2] }
 0x17e   : > { %s2461_s12 = smov (!%p346_p7, %s2212_s12), 0  ;;  %s912_s14 = scalar_lea.sflag %s2104_s7, 5 [#allocation3] }
 0x17f   : > { %s2463_s12 = smov (!%p1051_p9, %s2461_s12), 63  ;;  %s390_s8 = sadd.s32 6, %s2080_s19 }
 0x180   : > { %s2249_s0 = scalar_select %p1242_p0, [#allocation6], [#allocation53] }
 0x181   : > { %s1056_s21 = sshll.u32 %s2463_s12, 4 }
 0x182   : > { %s352_s30 = scalar_lea.hbm %s2398_s1, %s1056_s21 }
 0x183   : > { %s1641_s15 = scalar_lea.hbm %s352_s30, 16  ;;  %p1646_p13 = scmp.lt.u32.totalorder %s352_s30, %s2398_s1 }
 0x184   : > { %p1642_p4 = scmp.ne.s32.totalorder %s352_s30, %s1641_s15  ;;  %p1647_p1 = scmp.lt.u32.totalorder %s1912_s23, %s1641_s15 }
 0x185   : > { %p1649_p2 = scmp.lt.u32.totalorder %s1641_s15, %s352_s30 }
 0x186   : > { %p1643_p6 = pnand %p1642_p4, %p1242_p0  ;;  %p1648_p11 = por %p1647_p1, %p1646_p13 }
 0x188   : > { %p1644_p10 = pneg %p1643_p6  ;;  %p1650_p12 = por %p1649_p2, %p1648_p11 }
 0x18a   : > { %p1651_p8 = pnand %p1650_p12, %p1644_p10 }
 0x18c   : > { %1654 = shalt.err (!%p1651_p8)  }
 0x18d   : > { %s1655_s12 = scalar_lea.vmem %s2240_s4, 16  ;;  %p1662_p4 = scmp.lt.s32.totalorder %s2240_s4, %s1895_s9 }
 0x18e   : > { %p1656_p3 = scmp.ne.s32.totalorder %s2240_s4, %s1655_s12  ;;  %p1663_p6 = scmp.lt.s32.totalorder %s1921_s27, %s1655_s12 }
 0x190   : > { %p1657_p7 = pnand %p1656_p3, %p1242_p0  ;;  %p1664_p5 = por %p1663_p6, %p1662_p4 }
 0x192   : > { %p1658_p9 = pneg %p1657_p7 }
 0x194   : > { %p1665_p1 = pnand %p1664_p5, %p1658_p9 }
 0x196   : > { %1668 = shalt.err (!%p1665_p1)  }
 0x197   : > { %1232 = dma.hbm_to_vmem [thread:$0]  (%p1242_p0), %s352_s30, 16, %s2240_s4, %s904_s10 }
 0x198   : > { %p2408_p10 = scmp.gt.s32.totalorder %s2242_s28, 0  ;;  %p1059_p5 = scmp.lt.s32.totalorder %s2242_s28, 63 }
 0x199   : > { %s386_s20 = sshll.u32 %s909_s26, 4  ;;  %s2465_s8 = smov (!%p1242_p0, %s390_s8), 0  ;;  %s387_s20 = int_to_ptr.vmem [resolvable:$true] %s386_s20 }
 0x19a   : > { %s370_s2 = scalar_select %p2408_p10, %s2242_s28, 0 }
 0x19b   : > { %s2283_s21 = sld [smem:[%s2249_s0 + %s2465_s8]]  ;;  %s917_s24 = scalar_lea.vmem %s2091_s25, 6 [#allocation2] }
 0x19c   : > { %s2467_s2 = smov (!%p1059_p5, %s370_s2), 63  ;;  %s413_s12 = sadd.s32 7, %s2080_s19 }
 0x19d   : > { %s1064_s18 = sshll.u32 %s2467_s2, 4 }
 0x19e   : > { %s375_s29 = scalar_lea.hbm %s2398_s1, %s1064_s18 }
 0x19f   : > { %s1669_s4 = scalar_lea.hbm %s375_s29, 16  ;;  %p1674_p12 = scmp.lt.u32.totalorder %s375_s29, %s2398_s1 }
 0x1a0   : > { %p1670_p13 = scmp.ne.s32.totalorder %s375_s29, %s1669_s4  ;;  %p1675_p8 = scmp.lt.u32.totalorder %s1912_s23, %s1669_s4 }
 0x1a1   : > { %p1677_p7 = scmp.lt.u32.totalorder %s1669_s4, %s375_s29 }
 0x1a2   : > { %p1671_p11 = pnand %p1670_p13, %p1242_p0  ;;  %p1676_p3 = por %p1675_p8, %p1674_p12 }
 0x1a4   : > { %p1672_p2 = pneg %p1671_p11  ;;  %p1678_p9 = por %p1677_p7, %p1676_p3 }
 0x1a6   : > { %p1679_p4 = pnand %p1678_p9, %p1672_p2 }
 0x1a8   : > { %1682 = shalt.err (!%p1679_p4)  }
 0x1a9   : > { %s1683_s26 = scalar_lea.vmem %s387_s20, 16  ;;  %p1690_p5 = scmp.lt.s32.totalorder %s387_s20, %s1895_s9 }
 0x1aa   : > { %p1684_p6 = scmp.ne.s32.totalorder %s387_s20, %s1683_s26  ;;  %p1691_p13 = scmp.lt.s32.totalorder %s1921_s27, %s1683_s26 }
 0x1ac   : > { %p1685_p1 = pnand %p1684_p6, %p1242_p0  ;;  %p1692_p11 = por %p1691_p13, %p1690_p5 }
 0x1ae   : > { %p1686_p10 = pneg %p1685_p1 }
 0x1b0   : > { %p1693_p8 = pnand %p1692_p11, %p1686_p10 }
 0x1b2   : > { %1696 = shalt.err (!%p1693_p8)  }
 0x1b3   : > { %1235 = dma.hbm_to_vmem [thread:$0]  (%p1242_p0), %s375_s29, 16, %s387_s20, %s912_s14 }
 0x1b4   : > { %s1239_s19 = scalar_select %p1242_p0, [#allocation6], [#allocation54] }
 0x1b5   : > { %s2469_s12 = smov (!%p1242_p0, %s413_s12), 0  ;;  %p392_p2 = scmp.gt.s32.totalorder %s2283_s21, 0 }
 0x1b6   : > { %p1067_p12 = scmp.lt.s32.totalorder %s2283_s21, 63  ;;  %s409_s0 = sshll.u32 %s917_s24, 4  ;;  %s410_s0 = int_to_ptr.vmem [resolvable:$true] %s409_s0 }
 0x1b7   : > { %s2310_s8 = sld [smem:[%s1239_s19 + %s2469_s12]]  ;;  %s2471_s21 = smov (!%p392_p2, %s2283_s21), 0 }
 0x1b8   : > { %s2473_s21 = smov (!%p1067_p12, %s2471_s21), 63  ;;  %s920_s30 = scalar_lea.sflag %s2104_s7, 6 [#allocation3] }
 0x1b9   : > { %s1072_s2 = sshll.u32 %s2473_s21, 4  ;;  %s925_s18 = scalar_lea.vmem %s2091_s25, 7 [#allocation2] }
 0x1ba   : > { %s398_s20 = scalar_lea.hbm %s2398_s1, %s1072_s2 }
 0x1bb   : > { %s1697_s13 = scalar_lea.hbm %s398_s20, 16  ;;  %p1702_p6 = scmp.lt.u32.totalorder %s398_s20, %s2398_s1 }
 0x1bc   : > { %p1698_p7 = scmp.ne.s32.totalorder %s398_s20, %s1697_s13  ;;  %p1703_p1 = scmp.lt.u32.totalorder %s1912_s23, %s1697_s13 }
 0x1bd   : > { %p1705_p5 = scmp.lt.u32.totalorder %s1697_s13, %s398_s20 }
 0x1be   : > { %p1699_p9 = pnand %p1698_p7, %p1242_p0  ;;  %p1704_p10 = por %p1703_p1, %p1702_p6 }
 0x1c0   : > { %p1700_p4 = pneg %p1699_p9  ;;  %p1706_p13 = por %p1705_p5, %p1704_p10 }
 0x1c2   : > { %p1707_p11 = pnand %p1706_p13, %p1700_p4 }
 0x1c4   : > { %1710 = shalt.err (!%p1707_p11)  }
 0x1c5   : > { %s1711_s25 = scalar_lea.vmem %s410_s0, 16  ;;  %p1718_p7 = scmp.lt.s32.totalorder %s410_s0, %s1895_s9 }
 0x1c6   : > { %p1712_p8 = scmp.ne.s32.totalorder %s410_s0, %s1711_s25  ;;  %p1719_p9 = scmp.lt.s32.totalorder %s1921_s27, %s1711_s25 }
 0x1c8   : > { %p1713_p2 = pnand %p1712_p8, %p1242_p0  ;;  %p1720_p3 = por %p1719_p9, %p1718_p7 }
 0x1ca   : > { %p1714_p12 = pneg %p1713_p2 }
 0x1cc   : > { %p1721_p1 = pnand %p1720_p3, %p1714_p12 }
 0x1ce   : > { %1724 = shalt.err (!%p1721_p1)  }
 0x1cf   : > { %1238 = dma.hbm_to_vmem [thread:$0]  (%p1242_p0), %s398_s20, 16, %s410_s0, %s920_s30 }
 0x1d0   : > { %p2409_p4 = scmp.gt.s32.totalorder %s2310_s8, 0  ;;  %p1075_p6 = scmp.lt.s32.totalorder %s2310_s8, 63 }
 0x1d1   : > { %s432_s12 = sshll.u32 %s925_s18, 4  ;;  %s928_s4 = scalar_lea.sflag %s2104_s7, 7 [#allocation3]  ;;  %s433_s12 = int_to_ptr.vmem [resolvable:$true] %s432_s12 }
 0x1d2   : > { %s416_s21 = scalar_select %p2409_p4, %s2310_s8, 0 }
 0x1d4   : > { %s2475_s21 = smov (!%p1075_p6, %s416_s21), 63 }
 0x1d5   : > { %s1080_s10 = sshll.u32 %s2475_s21, 4 }
 0x1d6   : > { %s421_s19 = scalar_lea.hbm %s2398_s1, %s1080_s10 }
 0x1d7   : > { %s1725_s2 = scalar_lea.hbm %s421_s19, 16  ;;  %p1730_p13 = scmp.lt.u32.totalorder %s421_s19, %s2398_s1 }
 0x1d8   : > { %p1726_p3 = scmp.ne.s32.totalorder %s421_s19, %s1725_s2  ;;  %p1731_p11 = scmp.lt.u32.totalorder %s1912_s23, %s1725_s2 }
 0x1d9   : > { %p1733_p2 = scmp.lt.u32.totalorder %s1725_s2, %s421_s19 }
 0x1da   : > { %p1727_p10 = pnand %p1726_p3, %p1242_p0  ;;  %p1732_p8 = por %p1731_p11, %p1730_p13 }
 0x1dc   : > { %p1728_p5 = pneg %p1727_p10  ;;  %p1734_p12 = por %p1733_p2, %p1732_p8 }
 0x1de   : > { %p1735_p7 = pnand %p1734_p12, %p1728_p5 }
 0x1e0   : > { %1738 = shalt.err (!%p1735_p7)  }
 0x1e1   : > { %s1739_s7 = scalar_lea.vmem %s433_s12, 16  ;;  %p1746_p6 = scmp.lt.s32.totalorder %s433_s12, %s1895_s9 }
 0x1e2   : > { %p1740_p9 = scmp.ne.s32.totalorder %s433_s12, %s1739_s7  ;;  %p1747_p3 = scmp.lt.s32.totalorder %s1921_s27, %s1739_s7 }
 0x1e4   : > { %p1741_p1 = pnand %p1740_p9, %p1242_p0  ;;  %p1748_p10 = por %p1747_p3, %p1746_p6 }
 0x1e6   : > { %p1742_p4 = pneg %p1741_p1 }
 0x1e8   : > { %p1749_p11 = pnand %p1748_p10, %p1742_p4 }
 0x1ea   : > { %1752 = shalt.err (!%p1749_p11)  }
 0x1eb   : > { %1241 = dma.hbm_to_vmem [thread:$0]  (%p1242_p0), %s421_s19, 16, %s433_s12, %s928_s4 }
 0x1ec   : > { %s454_s0 = scalar_lea.sflag [#allocation3], %s1083_s22 }
 0x1ed   : > { %1785 = dma.done.wait %s454_s0, 16 }
 0x1ee   : > { %1786 = vsyncadd %s454_s0, 4294967280  ;;  %s933_s8 = scalar_lea.sflag %s454_s0, 1 [#allocation3] }
 0x1ef   : > { %1787 = dma.done.wait %s933_s8, 16 }
 0x1f0   : > { %1788 = vsyncadd %s933_s8, 4294967280  ;;  %s936_s30 = scalar_lea.sflag %s454_s0, 2 [#allocation3] }
 0x1f1   : > { %1789 = dma.done.wait %s936_s30, 16 }
 0x1f2   : > { %1790 = vsyncadd %s936_s30, 4294967280  ;;  %s939_s18 = scalar_lea.sflag %s454_s0, 3 [#allocation3] }
 0x1f3   : > { %1791 = dma.done.wait %s939_s18, 16 }
 0x1f4   : > { %1792 = vsyncadd %s939_s18, 4294967280  ;;  %s942_s20 = scalar_lea.sflag %s454_s0, 4 [#allocation3] }
 0x1f5   : > { %1793 = dma.done.wait %s942_s20, 16 }
 0x1f6   : > { %1794 = vsyncadd %s942_s20, 4294967280  ;;  %s945_s13 = scalar_lea.sflag %s454_s0, 5 [#allocation3] }
 0x1f7   : > { %1795 = dma.done.wait %s945_s13, 16 }
 0x1f8   : > { %1796 = vsyncadd %s945_s13, 4294967280  ;;  %s948_s24 = scalar_lea.sflag %s454_s0, 6 [#allocation3] }
 0x1f9   : > { %1797 = dma.done.wait %s948_s24, 16 }
 0x1fa   : > { %1798 = vsyncadd %s948_s24, 4294967280  ;;  %s951_s29 = scalar_lea.sflag %s454_s0, 7 [#allocation3] }
 0x1fb   : > { %1799 = dma.done.wait %s951_s29, 16 }
 0x1fc   : > { %1800 = vsyncadd %s951_s29, 4294967280  ;;  %s486_s25 = scalar_lea.vmem [#allocation2], %s1083_s22  ;;  %s495_s21 = scalar_lea.vmem [#allocation4], %s1805_s17 }
 0x1fd   : > { %v487_v1 = vld [vmem:[%s486_s25] sm:$0xff]  ;;  %s2410_s17 = smov %s2075_s11  ;;  %p2411_p0 = scmp.ge.s32.totalorder %s2075_s11, 2 }
 0x1fe   : > { %v488_v2 = vrot.slane %v487_v1, 4  ;;  %1177 = vmatprep.subr.bf16.mxu0 (%p2411_p0), %v1813_v0  ;;  %v1267_v9 = vld [vmem:[#allocation7] sm:$0xff] (%p2411_p0)   ;;  %1197 = vmatprep.subr.bf16.mxu1 (%p2411_p0), %v1813_v0  ;;  %vm1821_vm0 = vmmov (%p2411_p0), 0   ;;  %v1268_v10 = vld [vmem:[#allocation7 + $0x8] sm:$0xff] (%p2411_p0)   ;;  %v1269_v11 = vld [vmem:[#allocation7 + $0x10] sm:$0xff] (%p2411_p0)   ;;  %s1822_s17 = smov (%p2411_p0), [#allocation12]  }
 0x1ff   :  { %1193 = vmatprep.mubr.msk.bf16.mxu0 (%p2411_p0), %vm1821_vm0, %v1813_v0  ;;  %1213 = vmatprep.mubr.msk.bf16.mxu1 (%p2411_p0), %vm1821_vm0, %v1813_v0  ;;  %v1275_v12 = vld [vmem:[#allocation10] sm:$0xff] (%p2411_p0)   ;;  %v1270_v13 = vld [vmem:[#allocation7 + $0x18] sm:$0xff] (%p2411_p0)   ;;  %v1276_v14 = vld [vmem:[#allocation10 + $0x8] sm:$0xff] (%p2411_p0)   ;;  %s730_s11 = sshll.u32 (%p2411_p0), %s1822_s17, 4  ;;  %s731_s11 = int_to_ptr.vmem [resolvable:$true] %s730_s11 }
 0x200   : > { %v489_v3 = vadd.f32 %v488_v2, %v487_v1  ;;  %1178 = vmatpush3.bf16.msra.mxu0 (%p2411_p0), %v1267_v9  ;;  %1198 = vmatpush3.bf16.msra.mxu1 (%p2411_p0), %v1275_v12  ;;  %v1271_v15 = vld [vmem:[#allocation7 + $0x20] sm:$0xff] (%p2411_p0)   ;;  %v1277_v16 = vld [vmem:[#allocation10 + $0x10] sm:$0xff] (%p2411_p0)   ;;  %v1272_v17 = vld [vmem:[#allocation7 + $0x28] sm:$0xff] (%p2411_p0)   ;;  %p1758_p13 = scmp.lt.s32.totalorder (%p2411_p0), %s731_s11, %s731_s11 }
 0x201   :  { %1179 = vmatprep.subr.bf16.mxu0 (%p2411_p0), %v1813_v0  ;;  %1199 = vmatprep.subr.bf16.mxu1 (%p2411_p0), %v1813_v0  ;;  %v1278_v18 = vld [vmem:[#allocation10 + $0x18] sm:$0xff] (%p2411_p0)   ;;  %v1273_v19 = vld [vmem:[#allocation7 + $0x30] sm:$0xff] (%p2411_p0)   ;;  %v1279_v20 = vld [vmem:[#allocation10 + $0x20] sm:$0xff] (%p2411_p0)  }
 0x202   : > { %v490_v4 = vrot.slane %v489_v3, 2  ;;  %v1274_v21 = vld [vmem:[#allocation7 + $0x38] sm:$0xff] (%p2411_p0)   ;;  %v1280_v23 = vld [vmem:[#allocation10 + $0x28] sm:$0xff] (%p2411_p0)   ;;  %v1281_v25 = vld [vmem:[#allocation10 + $0x30] sm:$0xff] (%p2411_p0)  }
 0x203   :  { %v1282_v26 = vld [vmem:[#allocation10 + $0x38] sm:$0xff] (%p2411_p0)   ;;  %v1091_v27 = vld [vmem:[%s2400_s3] ss:$0 sm:$0xff] (%p2411_p0)  ;;  %s1753_s3 = scalar_lea.vmem (%p2411_p0), %s731_s11, 128 }
 0x204   : > { %v491_v5 = vadd.f32 %v490_v4, %v489_v3  ;;  %1180 = vmatpush3.bf16.msra.mxu0 (%p2411_p0), %v1268_v10  ;;  %1200 = vmatpush3.bf16.msra.mxu1 (%p2411_p0), %v1276_v14  ;;  %v1100_v35 = vld [vmem:[%s2402_s5] ss:$0 sm:$0xff] (%p2411_p0)  ;;  %p1754_p5 = scmp.ne.s32.totalorder (%p2411_p0), %s731_s11, %s1753_s3  ;;  %p1759_p8 = scmp.lt.s32.totalorder (%p2411_p0), %s1753_s3, %s1753_s3 }
 0x205   :  { %1181 = vmatprep.subr.bf16.mxu0 (%p2411_p0), %v1813_v0  ;;  %1201 = vmatprep.subr.bf16.mxu1 (%p2411_p0), %v1813_v0 }
 0x206   : > { %v492_v6 = vrot.slane %v491_v5, 1  ;;  %233 = sbr.rel (!%p2411_p0) target bundleno = 248 (0xf8), region = 194  ;;  %p1760_p2 = por (%p2411_p0), %p1759_p8, %p1758_p13 }
 0x208   : > { %v493_v7 = vadd.f32 %v492_v6, %v491_v5  ;;  %1182 = vmatpush3.bf16.msra.mxu0 (%p2411_p0), %v1269_v11  ;;  %1202 = vmatpush3.bf16.msra.mxu1 (%p2411_p0), %v1277_v16  ;;  %p1761_p12 = pnand (%p2411_p0), %p1760_p2, %p1754_p5 }
 0x209   :  { %1183 = vmatprep.subr.bf16.mxu0 (%p2411_p0), %v1813_v0  ;;  %1203 = vmatprep.subr.bf16.mxu1 (%p2411_p0), %v1813_v0 }
 0x20a   : > { %v494_v8 = vmul.f32 0.125, %v493_v7 }
 0x20c   : > { %496 = vst [vmem:[%s495_s21] sm:$0x1] %v494_v8  ;;  %1184 = vmatpush3.bf16.msra.mxu0 (%p2411_p0), %v1270_v13  ;;  %1204 = vmatpush3.bf16.msra.mxu1 (%p2411_p0), %v1278_v18 }
 0x20d   :  { %1185 = vmatprep.subr.bf16.mxu0 %v1813_v0  ;;  %1205 = vmatprep.subr.bf16.mxu1 %v1813_v0 }
 0x210   :  { %1186 = vmatpush3.bf16.msra.mxu0 %v1271_v15  ;;  %1206 = vmatpush3.bf16.msra.mxu1 %v1279_v20 }
 0x211   :  { %1187 = vmatprep.subr.bf16.mxu0 %v1813_v0  ;;  %1207 = vmatprep.subr.bf16.mxu1 %v1813_v0 }
 0x213   :  { %v497_v22 = vld [vmem:[#allocation4] sm:$0xff] }
 0x214   :  { %1188 = vmatpush3.bf16.msra.mxu0 %v1272_v17  ;;  %v498_v24 = vpack.c.bf16 %v497_v22, %v497_v22  ;;  %1208 = vmatpush3.bf16.msra.mxu1 %v1280_v23 }
 0x215   :  { %1189 = vmatprep.subr.bf16.mxu0 %v1813_v0  ;;  %1209 = vmatprep.subr.bf16.mxu1 %v1813_v0 }
 0x218   :  { %1190 = vmatpush3.bf16.msra.mxu0 %v1273_v19  ;;  %1210 = vmatpush3.bf16.msra.mxu1 %v1281_v25 }
 0x219   :  { %1191 = vmatprep.subr.bf16.mxu0 %v1813_v0  ;;  %1211 = vmatprep.subr.bf16.mxu1 %v1813_v0 }
 0x21c   :  { %1192 = vmatpush3.bf16.msra.mxu0 %v1274_v21  ;;  %1212 = vmatpush3.bf16.msra.mxu1 %v1282_v26 }
 0x21f   :  { %1194 = vmatmul.mubr.bf16.vlgmr.msra.gmra.mrb[0].mxu0 %v498_v24 }
 0x2f2   :  { %v604_v28 = vpop.f32.mrb[0].mxu0 }
 0x2f3   :  { %v605_v29 = vadd.f32 %v1091_v27, %v604_v28  ;;  %v1195_v30 = vpop.f32.mrb[1].mxu0 }
 0x2f4   :  { %v607_v31 = vpop.f32.mrb[2].mxu0 }
 0x2f5   :  { %v610_v32 = vmax.f32 %v605_v29, 0.0  ;;  %v1196_v33 = vpop.f32.mrb[3].mxu0 }
 0x2f7   :  { %v611_v34 = vpack.c.bf16 %v610_v32, %v610_v32 }
 0x2f9   :  { %1214 = vmatmul.mubr.bf16.vlgmr.msra.gmra.mrb[0].mxu1 %v611_v34 }
 0x3cc   :  { %v717_v36 = vpop.f32.mrb[0].mxu1 }
 0x3cd   :  { %v718_v37 = vadd.f32 %v1100_v35, %v717_v36  ;;  %v1215_v38 = vpop.f32.mrb[1].mxu1 }
 0x3ce   :  { %v720_v39 = vpop.f32.mrb[2].mxu1 }
 0x3cf   :  { %723 = vst [vmem:[#allocation12] sm:$0xff] %v718_v37  ;;  %v1216_v40 = vpop.f32.mrb[3].mxu1 }
 0x3d0   :  { %1764 = shalt.err (!%p1761_p12)
}
 0x3d1   :  { %s1765_s5 = scalar_lea.hbm %s2403_s6, 128 }
 0x3d2   :  { %p1766_p7 = scmp.ne.s32.totalorder %s2403_s6, %s1765_s5  ;;  %p1769_p9 = scmp.lt.u32.totalorder %s1765_s5, %s2403_s6 }
 0x3d4   :  { %p1771_p1 = pnand %p1769_p9, %p1766_p7 }
 0x3d6   :  { %1774 = shalt.err (!%p1771_p1)
}
 0x3d7   :  { %733 = dma.vmem_to_hbm [thread:$0]  %s731_s11, 128, %s2403_s6, [#allocation9]  }
 0x3d8   :  { %1801 = dma.done.wait [#allocation9], 128  }
 0x3d9   :  { %1802 = vsyncadd [#allocation9], 4294967168 }
 0x3da   :  { %737 = vsyncpa [#allocation8], 1 }
 0x3db   :  { %738 = vsyncpa [#allocation11], 1 }
 0x3dc   :  { %739 = vsyncpa [#allocation9], 1 }
 0x3dd   :  { %740 = vsyncmov [#allocation3] }
 0x3e0   :  { %s741_s2 = vpop.sfrf %740 }
 0x3e1   :  { %p1109_p4 = scmp.ne.s32.totalorder %s741_s2, 0 }
 0x3e3   :  { %745 = shalt.err (%p1109_p4)  }
 0x3e4   :  { %747 = vsyncmov [#allocation3 + $0x1] }
 0x3e7   :  { %s748_s15 = vpop.sfrf %747 }
 0x3e8   :  { %p1110_p6 = scmp.ne.s32.totalorder %s748_s15, 0 }
 0x3ea   :  { %752 = shalt.err (%p1110_p6)  }
 0x3eb   :  { %754 = vsyncmov [#allocation3 + $0x2] }
 0x3ee   :  { %s755_s14 = vpop.sfrf %754 }
 0x3ef   :  { %p1111_p3 = scmp.ne.s32.totalorder %s755_s14, 0 }
 0x3f1   :  { %759 = shalt.err (%p1111_p3)  }
 0x3f2   :  { %761 = vsyncmov [#allocation3 + $0x3] }
 0x3f5   :  { %s762_s7 = vpop.sfrf %761 }
 0x3f6   :  { %p1112_p10 = scmp.ne.s32.totalorder %s762_s7, 0 }
 0x3f8   :  { %766 = shalt.err (%p1112_p10)  }
 0x3f9   :  { %768 = vsyncmov [#allocation3 + $0x4] }
 0x3fc   :  { %s769_s6 = vpop.sfrf %768 }
 0x3fd   :  { %p1113_p11 = scmp.ne.s32.totalorder %s769_s6, 0 }
 0x3ff   :  { %773 = shalt.err (%p1113_p11)  }
 0x400   :  { %775 = vsyncmov [#allocation3 + $0x5] }
 0x403   :  { %s776_s0 = vpop.sfrf %775 }
 0x404   :  { %p1114_p0 = scmp.ne.s32.totalorder %s776_s0, 0 }
 0x406   :  { %780 = shalt.err (%p1114_p0)  }
 0x407   :  { %782 = vsyncmov [#allocation3 + $0x6] }
 0x40a   :  { %s783_s8 = vpop.sfrf %782 }
 0x40b   :  { %p1115_p5 = scmp.ne.s32.totalorder %s783_s8, 0 }
 0x40d   :  { %787 = shalt.err (%p1115_p5)  }
 0x40e   :  { %789 = vsyncmov [#allocation3 + $0x7] }
 0x411   :  { %s790_s30 = vpop.sfrf %789 }
 0x412   :  { %p1116_p13 = scmp.ne.s32.totalorder %s790_s30, 0 }
 0x414   :  { %794 = shalt.err (%p1116_p13)  }
 0x415   :  { %796 = vsyncmov [#allocation3 + $0x8] }
 0x418   :  { %s797_s18 = vpop.sfrf %796 }
 0x419   :  { %p1117_p8 = scmp.ne.s32.totalorder %s797_s18, 0 }
 0x41b   :  { %801 = shalt.err (%p1117_p8)  }
 0x41c   :  { %803 = vsyncmov [#allocation3 + $0x9] }
 0x41f   :  { %s804_s20 = vpop.sfrf %803 }
 0x420   :  { %p1118_p2 = scmp.ne.s32.totalorder %s804_s20, 0 }
 0x422   :  { %808 = shalt.err (%p1118_p2)  }
 0x423   :  { %810 = vsyncmov [#allocation3 + $0xa] }
 0x426   :  { %s811_s13 = vpop.sfrf %810 }
 0x427   :  { %p1119_p12 = scmp.ne.s32.totalorder %s811_s13, 0 }
 0x429   :  { %815 = shalt.err (%p1119_p12)  }
 0x42a   :  { %817 = vsyncmov [#allocation3 + $0xb] }
 0x42d   :  { %s818_s24 = vpop.sfrf %817 }
 0x42e   :  { %p1120_p7 = scmp.ne.s32.totalorder %s818_s24, 0 }
 0x430   :  { %822 = shalt.err (%p1120_p7)  }
 0x431   :  { %824 = vsyncmov [#allocation3 + $0xc] }
 0x434   :  { %s825_s29 = vpop.sfrf %824 }
 0x435   :  { %p1121_p9 = scmp.ne.s32.totalorder %s825_s29, 0 }
 0x437   :  { %829 = shalt.err (%p1121_p9)  }
 0x438   :  { %831 = vsyncmov [#allocation3 + $0xd] }
 0x43b   :  { %s832_s25 = vpop.sfrf %831 }
 0x43c   :  { %p1122_p1 = scmp.ne.s32.totalorder %s832_s25, 0 }
 0x43e   :  { %836 = shalt.err (%p1122_p1)  }
 0x43f   :  { %838 = vsyncmov [#allocation3 + $0xe] }
 0x442   :  { %s839_s21 = vpop.sfrf %838 }
 0x443   :  { %p1123_p4 = scmp.ne.s32.totalorder %s839_s21, 0 }
 0x445   :  { %843 = shalt.err (%p1123_p4)  }
 0x446   :  { %845 = vsyncmov [#allocation3 + $0xf] }
 0x449   :  { %s846_s1 = vpop.sfrf %845 }
 0x44a   :  { %p1124_p6 = scmp.ne.s32.totalorder %s846_s1, 0 }
 0x44c   :  { %850 = shalt.err (%p1124_p6)  }

</bundles_post_ra>
